<compile_context>
chip_gen: v6e
topology: v6e:2x2x1
jax: 0.10.0
libtpu: 0.0.40
codegen_flags: <defaults>
</compile_context>

<pallas_src>
import functools
import math

import jax
import jax.numpy as jnp
from jax.experimental import pallas as pl
from jax.experimental.pallas import tpu as pltpu  # noqa: F401  (kept for parity; no scratch needed)


# --------------------------- Fused forecaster kernel ---------------------------

def _forecaster_kernel(x2d_ref, wih_ref, whh_ref, bias_ref,
                       w1_ref, b1_ref, gamma_ref, beta_ref,
                       w2_ref, b2_ref, out_ref,
                       *, seq_len, batch, hidden_dim):
    T, B, H = seq_len, batch, hidden_dim
    HIGH = jax.lax.Precision.HIGHEST

    # Recurrent weight resident in vregs/VMEM for the whole kernel (loaded once).
    whh = whh_ref[...]                                          # (H, 4H)

    # Hoisted input projection + folded LSTM bias: one (T*B, D) x (D, 4H) matmul done
    # once, off the serial recurrence critical path.
    xw = (jnp.dot(x2d_ref[...], wih_ref[...],
                  preferred_element_type=jnp.float32, precision=HIGH)
          + bias_ref[...])                                      # (T*B, 4H)

    h = jnp.zeros((B, H), jnp.float32)
    c = jnp.zeros((B, H), jnp.float32)
    h_list = []

    # T-step LSTM recurrence, fully unrolled over the static T. Each step: one MXU push,
    # one sigmoid (full vreg), two tanh. Gate order is PyTorch's (i, f, g, o).
    for t in range(T):
        gates = xw[t * B:(t + 1) * B, :] + jnp.dot(
            h, whh, preferred_element_type=jnp.float32, precision=HIGH)   # (B, 4H)
        act = jax.nn.sigmoid(gates)            # one EUP push over the whole (B, 4H) vreg
        i_g = act[:, 0 * H:1 * H]
        f_g = act[:, 1 * H:2 * H]
        o_g = act[:, 3 * H:4 * H]
        g_g = jnp.tanh(gates[:, 2 * H:3 * H])
        c = f_g * c + i_g * g_g
        h = o_g * jnp.tanh(c)
        h_list.append(h)                       # stays in vregs (no scratch stores)

    # Time-major flatten, same as out.contiguous().view(-1, hidden_dim) in PyTorch.
    hs = jnp.concatenate(h_list, axis=0)                        # (T*B, H)

    # fc1
    z = (jnp.dot(hs, w1_ref[...], preferred_element_type=jnp.float32, precision=HIGH)
         + b1_ref[...])                                         # (T*B, H/2)

    # BatchNorm1d (training-mode batch stats, biased variance, eps=1e-5).
    # var = E[z^2] - mean^2 -> the two cross-sublane reductions are independent.
    mean = jnp.mean(z, axis=0, keepdims=True)                   # (1, H/2)
    mean_sq = jnp.mean(z * z, axis=0, keepdims=True)            # (1, H/2)
    var = mean_sq - mean * mean
    scale = gamma_ref[...] * jax.lax.rsqrt(var + 1e-5)
    shift = beta_ref[...] - mean * scale
    a = jnp.maximum(z * scale + shift, 0.0)                     # ReLU, (T*B, H/2)

    # Estimator (single output feature) on the VPU/XLU instead of the MXU:
    # broadcast-multiply by the w2 row, reduce over the lane (feature) axis.
    y = jnp.sum(a * w2_ref[...], axis=1, keepdims=True) + b2_ref[...]   # (T*B, 1)
    out_ref[...] = y


# ------------------------------ Parameters ------------------------------------

def make_params(key, input_dim, hidden_dim):
    """PyTorch-style init (uniform +-1/sqrt(fan)), then transposed/folded ONCE so the
    forward pass has zero per-call glue ops."""
    H, D = hidden_dim, input_dim
    Hh = H // 2
    ks = jax.random.split(key, 8)
    s_lstm = 1.0 / math.sqrt(H)

    w_ih = jax.random.uniform(ks[0], (4 * H, D), jnp.float32, -s_lstm, s_lstm)
    w_hh = jax.random.uniform(ks[1], (4 * H, H), jnp.float32, -s_lstm, s_lstm)
    b_ih = jax.random.uniform(ks[2], (4 * H,), jnp.float32, -s_lstm, s_lstm)
    b_hh = jax.random.uniform(ks[3], (4 * H,), jnp.float32, -s_lstm, s_lstm)

    s1 = 1.0 / math.sqrt(H)
    w1 = jax.random.uniform(ks[4], (Hh, H), jnp.float32, -s1, s1)
    b1 = jax.random.uniform(ks[5], (Hh,), jnp.float32, -s1, s1)

    s2 = 1.0 / math.sqrt(Hh)
    w2 = jax.random.uniform(ks[6], (1, Hh), jnp.float32, -s2, s2)
    b2 = jax.random.uniform(ks[7], (1,), jnp.float32, -s2, s2)

    gamma = jnp.ones((Hh,), jnp.float32)
    beta = jnp.zeros((Hh,), jnp.float32)

    # Pre-transpose / pre-fold (done once, at init).
    return dict(
        wih_t=jnp.asarray(w_ih.T),                   # (D, 4H)
        whh_t=jnp.asarray(w_hh.T),                   # (H, 4H)
        bias=(b_ih + b_hh).reshape(1, 4 * H),        # (1, 4H) folded LSTM bias
        w1_t=jnp.asarray(w1.T),                      # (H, H/2)
        b1=b1.reshape(1, Hh),                        # (1, H/2)
        gamma=gamma.reshape(1, Hh),                  # (1, H/2)
        beta=beta.reshape(1, Hh),                    # (1, H/2)
        w2=w2,                                       # (1, H/2) row used for VPU estimator
        b2=b2.reshape(1, 1),                         # (1, 1)
    )


# ------------------------------ Forward pass -----------------------------------

@jax.jit
def forecaster_forward(params, x):
    """x: (T, B, D) float32 -> (T*B, 1) float32 (same semantics as the PyTorch forward)."""
    T, B, D = x.shape
    H = params["whh_t"].shape[0]
    N = T * B

    x2d = x.reshape(N, D)   # time-major flatten for the hoisted input projection

    kernel = functools.partial(_forecaster_kernel, seq_len=T, batch=B, hidden_dim=H)
    y = pl.pallas_call(
        kernel,
        out_shape=jax.ShapeDtypeStruct((N, 1), jnp.float32),
    )(x2d, params["wih_t"], params["whh_t"], params["bias"],
      params["w1_t"], params["b1"], params["gamma"], params["beta"],
      params["w2"], params["b2"])

    return y


# ---------------------------------- Main ---------------------------------------

if __name__ == "__main__":
    T, B, D, H = 8, 4, 8, 32   # seq=8, batch=4, input_dim=8, hidden_dim=32

    key = jax.random.PRNGKey(0)
    k_params, k_x = jax.random.split(key)
    params = make_params(k_params, input_dim=D, hidden_dim=H)
    x = jax.random.normal(k_x, (T, B, D), dtype=jnp.float32)

    y = forecaster_forward(params, x)
    jax.block_until_ready(y)
    assert y.shape == (T * B, 1), y.shape
    print("KERNEL_OK")
</pallas_src>

<mosaic_0001>
module attributes {stable_mosaic.version = 11 : i64} {
  func.func @_forecaster_kernel(%arg0: memref<32x8xf32, #tpu.memory_space<vmem>>, %arg1: memref<8x128xf32, #tpu.memory_space<vmem>>, %arg2: memref<32x128xf32, #tpu.memory_space<vmem>>, %arg3: memref<1x128xf32, #tpu.memory_space<vmem>>, %arg4: memref<32x16xf32, #tpu.memory_space<vmem>>, %arg5: memref<1x16xf32, #tpu.memory_space<vmem>>, %arg6: memref<1x16xf32, #tpu.memory_space<vmem>>, %arg7: memref<1x16xf32, #tpu.memory_space<vmem>>, %arg8: memref<1x16xf32, #tpu.memory_space<vmem>>, %arg9: memref<1x1xf32, #tpu.memory_space<vmem>>, %arg10: memref<32x1xf32, #tpu.memory_space<vmem>>) attributes {dimension_semantics = [], scalar_prefetch = 0 : i64, scratch_operands = 0 : i64, tpu.core_type = #tpu.core_type<tc>} {
    %c0 = arith.constant 0 : index
    %c0_0 = arith.constant 0 : index
    %0 = vector.load %arg2[%c0, %c0_0] : memref<32x128xf32, #tpu.memory_space<vmem>>, vector<32x128xf32>
    %c0_1 = arith.constant 0 : index
    %c0_2 = arith.constant 0 : index
    %1 = vector.load %arg0[%c0_1, %c0_2] : memref<32x8xf32, #tpu.memory_space<vmem>>, vector<32x8xf32>
    %c0_3 = arith.constant 0 : index
    %c0_4 = arith.constant 0 : index
    %2 = vector.load %arg1[%c0_3, %c0_4] : memref<8x128xf32, #tpu.memory_space<vmem>>, vector<8x128xf32>
    %cst = arith.constant dense<0.000000e+00> : vector<32x128xf32>
    %3 = tpu.matmul %1, %2, %cst {dimension_numbers = #tpu.dot_dimension_numbers<[1], [0], [0], [1], [0, 0, 1, 1], [], []>, precision = #tpu.contract_precision<fp32>} : vector<32x8xf32>, vector<8x128xf32>, vector<32x128xf32> -> vector<32x128xf32>
    %c0_5 = arith.constant 0 : index
    %c0_6 = arith.constant 0 : index
    %4 = vector.load %arg3[%c0_5, %c0_6] : memref<1x128xf32, #tpu.memory_space<vmem>>, vector<1x128xf32>
    %5 = vector.broadcast %4 : vector<1x128xf32> to vector<32x128xf32>
    %6 = arith.addf %3, %5 : vector<32x128xf32>
    %cst_7 = arith.constant 0.000000e+00 : f32
    %7 = vector.broadcast %cst_7 : f32 to vector<4x32xf32>
    %cst_8 = arith.constant 0.000000e+00 : f32
    %8 = vector.broadcast %cst_8 : f32 to vector<4x32xf32>
    %9 = vector.extract_strided_slice %6 {offsets = [0, 0], sizes = [4, 128], strides = [1, 1]} : vector<32x128xf32> to vector<4x128xf32>
    %cst_9 = arith.constant dense<0.000000e+00> : vector<4x128xf32>
    %10 = tpu.matmul %7, %0, %cst_9 {dimension_numbers = #tpu.dot_dimension_numbers<[1], [0], [0], [1], [0, 0, 1, 1], [], []>, precision = #tpu.contract_precision<fp32>} : vector<4x32xf32>, vector<32x128xf32>, vector<4x128xf32> -> vector<4x128xf32>
    %11 = arith.addf %9, %10 : vector<4x128xf32>
    %12 = arith.negf %11 : vector<4x128xf32>
    %13 = math.exp %12 : vector<4x128xf32>
    %cst_10 = arith.constant 1.000000e+00 : f32
    %14 = vector.broadcast %cst_10 : f32 to vector<4x128xf32>
    %15 = arith.addf %14, %13 : vector<4x128xf32>
    %16 = arith.divf %14, %15 : vector<4x128xf32>
    %17 = vector.extract_strided_slice %16 {offsets = [0, 0], sizes = [4, 32], strides = [1, 1]} : vector<4x128xf32> to vector<4x32xf32>
    %18 = vector.extract_strided_slice %16 {offsets = [0, 32], sizes = [4, 32], strides = [1, 1]} : vector<4x128xf32> to vector<4x32xf32>
    %19 = vector.extract_strided_slice %16 {offsets = [0, 96], sizes = [4, 32], strides = [1, 1]} : vector<4x128xf32> to vector<4x32xf32>
    %20 = vector.extract_strided_slice %11 {offsets = [0, 64], sizes = [4, 32], strides = [1, 1]} : vector<4x128xf32> to vector<4x32xf32>
    %21 = math.tanh %20 : vector<4x32xf32>
    %22 = arith.mulf %18, %8 : vector<4x32xf32>
    %23 = arith.mulf %17, %21 : vector<4x32xf32>
    %24 = arith.addf %22, %23 : vector<4x32xf32>
    %25 = math.tanh %24 : vector<4x32xf32>
    %26 = arith.mulf %19, %25 : vector<4x32xf32>
    %27 = vector.extract_strided_slice %6 {offsets = [4, 0], sizes = [4, 128], strides = [1, 1]} : vector<32x128xf32> to vector<4x128xf32>
    %cst_11 = arith.constant dense<0.000000e+00> : vector<4x128xf32>
    %28 = tpu.matmul %26, %0, %cst_11 {dimension_numbers = #tpu.dot_dimension_numbers<[1], [0], [0], [1], [0, 0, 1, 1], [], []>, precision = #tpu.contract_precision<fp32>} : vector<4x32xf32>, vector<32x128xf32>, vector<4x128xf32> -> vector<4x128xf32>
    %29 = arith.addf %27, %28 : vector<4x128xf32>
    %30 = arith.negf %29 : vector<4x128xf32>
    %31 = math.exp %30 : vector<4x128xf32>
    %cst_12 = arith.constant 1.000000e+00 : f32
    %32 = vector.broadcast %cst_12 : f32 to vector<4x128xf32>
    %33 = arith.addf %32, %31 : vector<4x128xf32>
    %34 = arith.divf %32, %33 : vector<4x128xf32>
    %35 = vector.extract_strided_slice %34 {offsets = [0, 0], sizes = [4, 32], strides = [1, 1]} : vector<4x128xf32> to vector<4x32xf32>
    %36 = vector.extract_strided_slice %34 {offsets = [0, 32], sizes = [4, 32], strides = [1, 1]} : vector<4x128xf32> to vector<4x32xf32>
    %37 = vector.extract_strided_slice %34 {offsets = [0, 96], sizes = [4, 32], strides = [1, 1]} : vector<4x128xf32> to vector<4x32xf32>
    %38 = vector.extract_strided_slice %29 {offsets = [0, 64], sizes = [4, 32], strides = [1, 1]} : vector<4x128xf32> to vector<4x32xf32>
    %39 = math.tanh %38 : vector<4x32xf32>
    %40 = arith.mulf %36, %24 : vector<4x32xf32>
    %41 = arith.mulf %35, %39 : vector<4x32xf32>
    %42 = arith.addf %40, %41 : vector<4x32xf32>
    %43 = math.tanh %42 : vector<4x32xf32>
    %44 = arith.mulf %37, %43 : vector<4x32xf32>
    %45 = vector.extract_strided_slice %6 {offsets = [8, 0], sizes = [4, 128], strides = [1, 1]} : vector<32x128xf32> to vector<4x128xf32>
    %cst_13 = arith.constant dense<0.000000e+00> : vector<4x128xf32>
    %46 = tpu.matmul %44, %0, %cst_13 {dimension_numbers = #tpu.dot_dimension_numbers<[1], [0], [0], [1], [0, 0, 1, 1], [], []>, precision = #tpu.contract_precision<fp32>} : vector<4x32xf32>, vector<32x128xf32>, vector<4x128xf32> -> vector<4x128xf32>
    %47 = arith.addf %45, %46 : vector<4x128xf32>
    %48 = arith.negf %47 : vector<4x128xf32>
    %49 = math.exp %48 : vector<4x128xf32>
    %cst_14 = arith.constant 1.000000e+00 : f32
    %50 = vector.broadcast %cst_14 : f32 to vector<4x128xf32>
    %51 = arith.addf %50, %49 : vector<4x128xf32>
    %52 = arith.divf %50, %51 : vector<4x128xf32>
    %53 = vector.extract_strided_slice %52 {offsets = [0, 0], sizes = [4, 32], strides = [1, 1]} : vector<4x128xf32> to vector<4x32xf32>
    %54 = vector.extract_strided_slice %52 {offsets = [0, 32], sizes = [4, 32], strides = [1, 1]} : vector<4x128xf32> to vector<4x32xf32>
    %55 = vector.extract_strided_slice %52 {offsets = [0, 96], sizes = [4, 32], strides = [1, 1]} : vector<4x128xf32> to vector<4x32xf32>
    %56 = vector.extract_strided_slice %47 {offsets = [0, 64], sizes = [4, 32], strides = [1, 1]} : vector<4x128xf32> to vector<4x32xf32>
    %57 = math.tanh %56 : vector<4x32xf32>
    %58 = arith.mulf %54, %42 : vector<4x32xf32>
    %59 = arith.mulf %53, %57 : vector<4x32xf32>
    %60 = arith.addf %58, %59 : vector<4x32xf32>
    %61 = math.tanh %60 : vector<4x32xf32>
    %62 = arith.mulf %55, %61 : vector<4x32xf32>
    %63 = vector.extract_strided_slice %6 {offsets = [12, 0], sizes = [4, 128], strides = [1, 1]} : vector<32x128xf32> to vector<4x128xf32>
    %cst_15 = arith.constant dense<0.000000e+00> : vector<4x128xf32>
    %64 = tpu.matmul %62, %0, %cst_15 {dimension_numbers = #tpu.dot_dimension_numbers<[1], [0], [0], [1], [0, 0, 1, 1], [], []>, precision = #tpu.contract_precision<fp32>} : vector<4x32xf32>, vector<32x128xf32>, vector<4x128xf32> -> vector<4x128xf32>
    %65 = arith.addf %63, %64 : vector<4x128xf32>
    %66 = arith.negf %65 : vector<4x128xf32>
    %67 = math.exp %66 : vector<4x128xf32>
    %cst_16 = arith.constant 1.000000e+00 : f32
    %68 = vector.broadcast %cst_16 : f32 to vector<4x128xf32>
    %69 = arith.addf %68, %67 : vector<4x128xf32>
    %70 = arith.divf %68, %69 : vector<4x128xf32>
    %71 = vector.extract_strided_slice %70 {offsets = [0, 0], sizes = [4, 32], strides = [1, 1]} : vector<4x128xf32> to vector<4x32xf32>
    %72 = vector.extract_strided_slice %70 {offsets = [0, 32], sizes = [4, 32], strides = [1, 1]} : vector<4x128xf32> to vector<4x32xf32>
    %73 = vector.extract_strided_slice %70 {offsets = [0, 96], sizes = [4, 32], strides = [1, 1]} : vector<4x128xf32> to vector<4x32xf32>
    %74 = vector.extract_strided_slice %65 {offsets = [0, 64], sizes = [4, 32], strides = [1, 1]} : vector<4x128xf32> to vector<4x32xf32>
    %75 = math.tanh %74 : vector<4x32xf32>
    %76 = arith.mulf %72, %60 : vector<4x32xf32>
    %77 = arith.mulf %71, %75 : vector<4x32xf32>
    %78 = arith.addf %76, %77 : vector<4x32xf32>
    %79 = math.tanh %78 : vector<4x32xf32>
    %80 = arith.mulf %73, %79 : vector<4x32xf32>
    %81 = vector.extract_strided_slice %6 {offsets = [16, 0], sizes = [4, 128], strides = [1, 1]} : vector<32x128xf32> to vector<4x128xf32>
    %cst_17 = arith.constant dense<0.000000e+00> : vector<4x128xf32>
    %82 = tpu.matmul %80, %0, %cst_17 {dimension_numbers = #tpu.dot_dimension_numbers<[1], [0], [0], [1], [0, 0, 1, 1], [], []>, precision = #tpu.contract_precision<fp32>} : vector<4x32xf32>, vector<32x128xf32>, vector<4x128xf32> -> vector<4x128xf32>
    %83 = arith.addf %81, %82 : vector<4x128xf32>
    %84 = arith.negf %83 : vector<4x128xf32>
    %85 = math.exp %84 : vector<4x128xf32>
    %cst_18 = arith.constant 1.000000e+00 : f32
    %86 = vector.broadcast %cst_18 : f32 to vector<4x128xf32>
    %87 = arith.addf %86, %85 : vector<4x128xf32>
    %88 = arith.divf %86, %87 : vector<4x128xf32>
    %89 = vector.extract_strided_slice %88 {offsets = [0, 0], sizes = [4, 32], strides = [1, 1]} : vector<4x128xf32> to vector<4x32xf32>
    %90 = vector.extract_strided_slice %88 {offsets = [0, 32], sizes = [4, 32], strides = [1, 1]} : vector<4x128xf32> to vector<4x32xf32>
    %91 = vector.extract_strided_slice %88 {offsets = [0, 96], sizes = [4, 32], strides = [1, 1]} : vector<4x128xf32> to vector<4x32xf32>
    %92 = vector.extract_strided_slice %83 {offsets = [0, 64], sizes = [4, 32], strides = [1, 1]} : vector<4x128xf32> to vector<4x32xf32>
    %93 = math.tanh %92 : vector<4x32xf32>
    %94 = arith.mulf %90, %78 : vector<4x32xf32>
    %95 = arith.mulf %89, %93 : vector<4x32xf32>
    %96 = arith.addf %94, %95 : vector<4x32xf32>
    %97 = math.tanh %96 : vector<4x32xf32>
    %98 = arith.mulf %91, %97 : vector<4x32xf32>
    %99 = vector.extract_strided_slice %6 {offsets = [20, 0], sizes = [4, 128], strides = [1, 1]} : vector<32x128xf32> to vector<4x128xf32>
    %cst_19 = arith.constant dense<0.000000e+00> : vector<4x128xf32>
    %100 = tpu.matmul %98, %0, %cst_19 {dimension_numbers = #tpu.dot_dimension_numbers<[1], [0], [0], [1], [0, 0, 1, 1], [], []>, precision = #tpu.contract_precision<fp32>} : vector<4x32xf32>, vector<32x128xf32>, vector<4x128xf32> -> vector<4x128xf32>
    %101 = arith.addf %99, %100 : vector<4x128xf32>
    %102 = arith.negf %101 : vector<4x128xf32>
    %103 = math.exp %102 : vector<4x128xf32>
    %cst_20 = arith.constant 1.000000e+00 : f32
    %104 = vector.broadcast %cst_20 : f32 to vector<4x128xf32>
    %105 = arith.addf %104, %103 : vector<4x128xf32>
    %106 = arith.divf %104, %105 : vector<4x128xf32>
    %107 = vector.extract_strided_slice %106 {offsets = [0, 0], sizes = [4, 32], strides = [1, 1]} : vector<4x128xf32> to vector<4x32xf32>
    %108 = vector.extract_strided_slice %106 {offsets = [0, 32], sizes = [4, 32], strides = [1, 1]} : vector<4x128xf32> to vector<4x32xf32>
    %109 = vector.extract_strided_slice %106 {offsets = [0, 96], sizes = [4, 32], strides = [1, 1]} : vector<4x128xf32> to vector<4x32xf32>
    %110 = vector.extract_strided_slice %101 {offsets = [0, 64], sizes = [4, 32], strides = [1, 1]} : vector<4x128xf32> to vector<4x32xf32>
    %111 = math.tanh %110 : vector<4x32xf32>
    %112 = arith.mulf %108, %96 : vector<4x32xf32>
    %113 = arith.mulf %107, %111 : vector<4x32xf32>
    %114 = arith.addf %112, %113 : vector<4x32xf32>
    %115 = math.tanh %114 : vector<4x32xf32>
    %116 = arith.mulf %109, %115 : vector<4x32xf32>
    %117 = vector.extract_strided_slice %6 {offsets = [24, 0], sizes = [4, 128], strides = [1, 1]} : vector<32x128xf32> to vector<4x128xf32>
    %cst_21 = arith.constant dense<0.000000e+00> : vector<4x128xf32>
    %118 = tpu.matmul %116, %0, %cst_21 {dimension_numbers = #tpu.dot_dimension_numbers<[1], [0], [0], [1], [0, 0, 1, 1], [], []>, precision = #tpu.contract_precision<fp32>} : vector<4x32xf32>, vector<32x128xf32>, vector<4x128xf32> -> vector<4x128xf32>
    %119 = arith.addf %117, %118 : vector<4x128xf32>
    %120 = arith.negf %119 : vector<4x128xf32>
    %121 = math.exp %120 : vector<4x128xf32>
    %cst_22 = arith.constant 1.000000e+00 : f32
    %122 = vector.broadcast %cst_22 : f32 to vector<4x128xf32>
    %123 = arith.addf %122, %121 : vector<4x128xf32>
    %124 = arith.divf %122, %123 : vector<4x128xf32>
    %125 = vector.extract_strided_slice %124 {offsets = [0, 0], sizes = [4, 32], strides = [1, 1]} : vector<4x128xf32> to vector<4x32xf32>
    %126 = vector.extract_strided_slice %124 {offsets = [0, 32], sizes = [4, 32], strides = [1, 1]} : vector<4x128xf32> to vector<4x32xf32>
    %127 = vector.extract_strided_slice %124 {offsets = [0, 96], sizes = [4, 32], strides = [1, 1]} : vector<4x128xf32> to vector<4x32xf32>
    %128 = vector.extract_strided_slice %119 {offsets = [0, 64], sizes = [4, 32], strides = [1, 1]} : vector<4x128xf32> to vector<4x32xf32>
    %129 = math.tanh %128 : vector<4x32xf32>
    %130 = arith.mulf %126, %114 : vector<4x32xf32>
    %131 = arith.mulf %125, %129 : vector<4x32xf32>
    %132 = arith.addf %130, %131 : vector<4x32xf32>
    %133 = math.tanh %132 : vector<4x32xf32>
    %134 = arith.mulf %127, %133 : vector<4x32xf32>
    %135 = vector.extract_strided_slice %6 {offsets = [28, 0], sizes = [4, 128], strides = [1, 1]} : vector<32x128xf32> to vector<4x128xf32>
    %cst_23 = arith.constant dense<0.000000e+00> : vector<4x128xf32>
    %136 = tpu.matmul %134, %0, %cst_23 {dimension_numbers = #tpu.dot_dimension_numbers<[1], [0], [0], [1], [0, 0, 1, 1], [], []>, precision = #tpu.contract_precision<fp32>} : vector<4x32xf32>, vector<32x128xf32>, vector<4x128xf32> -> vector<4x128xf32>
    %137 = arith.addf %135, %136 : vector<4x128xf32>
    %138 = arith.negf %137 : vector<4x128xf32>
    %139 = math.exp %138 : vector<4x128xf32>
    %cst_24 = arith.constant 1.000000e+00 : f32
    %140 = vector.broadcast %cst_24 : f32 to vector<4x128xf32>
    %141 = arith.addf %140, %139 : vector<4x128xf32>
    %142 = arith.divf %140, %141 : vector<4x128xf32>
    %143 = vector.extract_strided_slice %142 {offsets = [0, 0], sizes = [4, 32], strides = [1, 1]} : vector<4x128xf32> to vector<4x32xf32>
    %144 = vector.extract_strided_slice %142 {offsets = [0, 32], sizes = [4, 32], strides = [1, 1]} : vector<4x128xf32> to vector<4x32xf32>
    %145 = vector.extract_strided_slice %142 {offsets = [0, 96], sizes = [4, 32], strides = [1, 1]} : vector<4x128xf32> to vector<4x32xf32>
    %146 = vector.extract_strided_slice %137 {offsets = [0, 64], sizes = [4, 32], strides = [1, 1]} : vector<4x128xf32> to vector<4x32xf32>
    %147 = math.tanh %146 : vector<4x32xf32>
    %148 = arith.mulf %144, %132 : vector<4x32xf32>
    %149 = arith.mulf %143, %147 : vector<4x32xf32>
    %150 = arith.addf %148, %149 : vector<4x32xf32>
    %151 = math.tanh %150 : vector<4x32xf32>
    %152 = arith.mulf %145, %151 : vector<4x32xf32>
    %153 = tpu.concatenate %26, %44, %62, %80, %98, %116, %134, %152 in 0 : vector<4x32xf32>, vector<4x32xf32>, vector<4x32xf32>, vector<4x32xf32>, vector<4x32xf32>, vector<4x32xf32>, vector<4x32xf32>, vector<4x32xf32> -> vector<32x32xf32>
    %c0_25 = arith.constant 0 : index
    %c0_26 = arith.constant 0 : index
    %154 = vector.load %arg4[%c0_25, %c0_26] : memref<32x16xf32, #tpu.memory_space<vmem>>, vector<32x16xf32>
    %cst_27 = arith.constant dense<0.000000e+00> : vector<32x16xf32>
    %155 = tpu.matmul %153, %154, %cst_27 {dimension_numbers = #tpu.dot_dimension_numbers<[1], [0], [0], [1], [0, 0, 1, 1], [], []>, precision = #tpu.contract_precision<fp32>} : vector<32x32xf32>, vector<32x16xf32>, vector<32x16xf32> -> vector<32x16xf32>
    %c0_28 = arith.constant 0 : index
    %c0_29 = arith.constant 0 : index
    %156 = vector.load %arg5[%c0_28, %c0_29] : memref<1x16xf32, #tpu.memory_space<vmem>>, vector<1x16xf32>
    %157 = vector.broadcast %156 : vector<1x16xf32> to vector<32x16xf32>
    %158 = arith.addf %155, %157 : vector<32x16xf32>
    %cst_30 = arith.constant dense<0.000000e+00> : vector<16xf32>
    %159 = vector.multi_reduction <add>, %158, %cst_30 [0] : vector<32x16xf32> to vector<16xf32>
    %160 = vector.shape_cast %159 : vector<16xf32> to vector<1x16xf32>
    %cst_31 = arith.constant 3.200000e+01 : f32
    %161 = vector.broadcast %cst_31 : f32 to vector<1x16xf32>
    %162 = arith.divf %160, %161 : vector<1x16xf32>
    %163 = arith.mulf %158, %158 : vector<32x16xf32>
    %cst_32 = arith.constant dense<0.000000e+00> : vector<16xf32>
    %164 = vector.multi_reduction <add>, %163, %cst_32 [0] : vector<32x16xf32> to vector<16xf32>
    %165 = vector.shape_cast %164 : vector<16xf32> to vector<1x16xf32>
    %cst_33 = arith.constant 3.200000e+01 : f32
    %166 = vector.broadcast %cst_33 : f32 to vector<1x16xf32>
    %167 = arith.divf %165, %166 : vector<1x16xf32>
    %168 = arith.mulf %162, %162 : vector<1x16xf32>
    %169 = arith.subf %167, %168 : vector<1x16xf32>
    %c0_34 = arith.constant 0 : index
    %c0_35 = arith.constant 0 : index
    %170 = vector.load %arg6[%c0_34, %c0_35] : memref<1x16xf32, #tpu.memory_space<vmem>>, vector<1x16xf32>
    %cst_36 = arith.constant 9.99999974E-6 : f32
    %171 = vector.broadcast %cst_36 : f32 to vector<1x16xf32>
    %172 = arith.addf %169, %171 : vector<1x16xf32>
    %173 = math.rsqrt %172 : vector<1x16xf32>
    %174 = arith.mulf %170, %173 : vector<1x16xf32>
    %c0_37 = arith.constant 0 : index
    %c0_38 = arith.constant 0 : index
    %175 = vector.load %arg7[%c0_37, %c0_38] : memref<1x16xf32, #tpu.memory_space<vmem>>, vector<1x16xf32>
    %176 = arith.mulf %162, %174 : vector<1x16xf32>
    %177 = arith.subf %175, %176 : vector<1x16xf32>
    %178 = vector.broadcast %174 : vector<1x16xf32> to vector<32x16xf32>
    %179 = arith.mulf %158, %178 : vector<32x16xf32>
    %180 = vector.broadcast %177 : vector<1x16xf32> to vector<32x16xf32>
    %181 = arith.addf %179, %180 : vector<32x16xf32>
    %cst_39 = arith.constant 0.000000e+00 : f32
    %182 = vector.broadcast %cst_39 : f32 to vector<32x16xf32>
    %183 = arith.maximumf %181, %182 : vector<32x16xf32>
    %c0_40 = arith.constant 0 : index
    %c0_41 = arith.constant 0 : index
    %184 = vector.load %arg8[%c0_40, %c0_41] : memref<1x16xf32, #tpu.memory_space<vmem>>, vector<1x16xf32>
    %185 = vector.broadcast %184 : vector<1x16xf32> to vector<32x16xf32>
    %186 = arith.mulf %183, %185 : vector<32x16xf32>
    %cst_42 = arith.constant dense<0.000000e+00> : vector<32xf32>
    %187 = vector.multi_reduction <add>, %186, %cst_42 [1] : vector<32x16xf32> to vector<32xf32>
    %188 = vector.shape_cast %187 : vector<32xf32> to vector<32x1xf32>
    %c0_43 = arith.constant 0 : index
    %c0_44 = arith.constant 0 : index
    %189 = vector.load %arg9[%c0_43, %c0_44] : memref<1x1xf32, #tpu.memory_space<vmem>>, vector<1x1xf32>
    %190 = vector.broadcast %189 : vector<1x1xf32> to vector<32x1xf32>
    %191 = arith.addf %188, %190 : vector<32x1xf32>
    %c0_45 = arith.constant 0 : index
    %c0_46 = arith.constant 0 : index
    %192 = vector.load %arg10[%c0_45, %c0_46] : memref<32x1xf32, #tpu.memory_space<vmem>>, vector<32x1xf32>
    tpu.vector_store %arg10[%c0_45, %c0_46], %191 {strides = array<i32>} : memref<32x1xf32, #tpu.memory_space<vmem>>, vector<32x1xf32>,
    return
  }
}

</mosaic_0001>

<bundles_post_ra>
// kernel: forecaster_forward.1
= control target key start
LH: loop header
LB: loop body
LE: loop exit
PB: predicated region body
PF: predicated region fallthrough
CT: control target
= control target key end

     0   :  { %s7767_s0 = inlined_call_operand.vmem [shape: f32[32,8], index: 0, kind: input, shape index: {}]   ;;  %s7768_s1 = inlined_call_operand.hbm [shape: f32[8,128], index: 1, kind: input, shape index: {}]   ;;  %s7769_s2 = inlined_call_operand.vmem [shape: f32[32,128], index: 2, kind: input, shape index: {}]   ;;  %s7770_s3 = inlined_call_operand.hbm [shape: f32[1,128], index: 3, kind: input, shape index: {}]   ;;  %s7771_s4 = inlined_call_operand.vmem [shape: f32[32,16], index: 4, kind: input, shape index: {}]   ;;  %s7772_s5 = inlined_call_operand.hbm [shape: f32[1,16], index: 5, kind: input, shape index: {}]   ;;  %s7773_s6 = inlined_call_operand.hbm [shape: f32[1,16], index: 6, kind: input, shape index: {}]   ;;  %s7774_s7 = inlined_call_operand.hbm [shape: f32[1,16], index: 7, kind: input, shape index: {}]   ;;  %s7775_s8 = inlined_call_operand.hbm [shape: f32[1,16], index: 8, kind: input, shape index: {}]   ;;  %s7776_s9 = inlined_call_operand.<no memory space> [shape: f32[1,1], index: 9, kind: input, shape index: {}]   ;;  %s7777_s10 = inlined_call_operand.vmem [shape: f32[32,1], index: 10, kind: output, shape index: {}]  }
   0x1   :  { %v15_v0 = vstv %s7776_s9 }
   0x2   :  { %16 = vst [vmem:[#allocation2] sm:$0x1] %v15_v0 }
   0x3   :  { %17 = vsyncpa [#allocation4], 0 }
   0x4   :  { %18 = vsyncpa [#allocation6], 0 }
   0x5   :  { %19 = vsyncpa [#allocation9], 0 }
   0x6   :  { %20 = vsyncpa [#allocation12], 0  ;;  %s6824_s15 = smov [#allocation5]   ;;  %s6825_s17 = smov [#allocation8]  }
   0x7   :  { %s41_s16 = sshll.u32 %s6824_s15, 4  ;;  %s63_s18 = sshll.u32 %s6825_s17, 4  ;;  %s42_s16 = int_to_ptr.vmem [resolvable:$true] %s41_s16  ;;  %s64_s18 = int_to_ptr.vmem [resolvable:$true] %s63_s18 }
   0x8   :  { %s6704_s19 = scalar_lea.vmem %s42_s16, 16  ;;  %s6708_s20 = scalar_lea.vmem %s42_s16, 32 }
   0x9   :  { %p6705_p0 = scmp.ne.s32.totalorder %s42_s16, %s6704_s19  ;;  %p6709_p1 = scmp.lt.s32.totalorder %s42_s16, %s42_s16 }
   0xa   :  { %p6710_p2 = scmp.lt.s32.totalorder %s6708_s20, %s6704_s19 }
   0xc   :  { %p6711_p3 = por %p6710_p2, %p6709_p1 }
   0xe   :  { %p6712_p4 = pnand %p6711_p3, %p6705_p0 }
  0x10   :  { %6715 = shalt.err (!%p6712_p4)
}
  0x11   :  { %44 = dma.hbm_to_vmem [thread:$0]  %s7770_s3, 16, %s42_s16, [#allocation6]  }
  0x12   :  { %s6724_s22 = scalar_lea.vmem %s64_s18, 16  ;;  %s6728_s23 = scalar_lea.vmem %s64_s18, 32 }
  0x13   :  { %p6725_p5 = scmp.ne.s32.totalorder %s64_s18, %s6724_s22  ;;  %p6729_p6 = scmp.lt.s32.totalorder %s64_s18, %s64_s18 }
  0x14   :  { %p6730_p7 = scmp.lt.s32.totalorder %s6728_s23, %s6724_s22 }
  0x16   :  { %p6731_p8 = por %p6730_p7, %p6729_p6 }
  0x18   :  { %p6732_p9 = pnand %p6731_p8, %p6725_p5 }
  0x1a   :  { %6735 = shalt.err (!%p6732_p9)
}
  0x1b   :  { %66 = dma.hbm_to_vmem [thread:$0]  %s7773_s6, 16, %s64_s18, [#allocation9]  }
  0x1c   :  { %s6826_s26 = smov [#allocation3]   ;;  %s6827_s28 = smov [#allocation7]  }
  0x1d   :  { %s29_s27 = sshll.u32 %s6826_s26, 4  ;;  %s53_s29 = sshll.u32 %s6827_s28, 4  ;;  %s30_s27 = int_to_ptr.vmem [resolvable:$true] %s29_s27  ;;  %s54_s29 = int_to_ptr.vmem [resolvable:$true] %s53_s29 }
  0x1e   :  { %s6744_s30 = scalar_lea.vmem %s30_s27, 128  ;;  %p6749_p11 = scmp.lt.s32.totalorder %s30_s27, %s30_s27 }
  0x1f   :  { %p6745_p10 = scmp.ne.s32.totalorder %s30_s27, %s6744_s30  ;;  %p6750_p12 = scmp.lt.s32.totalorder %s6744_s30, %s6744_s30 }
  0x21   :  { %p6751_p13 = por %p6750_p12, %p6749_p11 }
  0x23   :  { %p6752_p0 = pnand %p6751_p13, %p6745_p10 }
  0x25   :  { %6755 = shalt.err (!%p6752_p0)
}
  0x26   :  { %32 = dma.hbm_to_vmem [thread:$0]  %s7768_s1, 128, %s30_s27, [#allocation4]  }
  0x27   :  { %s6764_s12 = scalar_lea.vmem %s54_s29, 16  ;;  %s6768_s6 = scalar_lea.vmem %s54_s29, 32 }
  0x28   :  { %p6765_p1 = scmp.ne.s32.totalorder %s54_s29, %s6764_s12  ;;  %p6769_p2 = scmp.lt.s32.totalorder %s54_s29, %s54_s29 }
  0x29   :  { %p6770_p3 = scmp.lt.s32.totalorder %s6768_s6, %s6764_s12 }
  0x2b   :  { %p6771_p4 = por %p6770_p3, %p6769_p2 }
  0x2d   :  { %p6772_p5 = pnand %p6771_p4, %p6765_p1 }
  0x2f   :  { %6775 = shalt.err (!%p6772_p5)
}
  0x30   :  { %56 = dma.hbm_to_vmem [thread:$0]  %s7772_s5, 16, %s54_s29, [#allocation6]  }
  0x31   :  { %s6828_s15 = smov [#allocation10]   ;;  %s6829_s17 = smov [#allocation11]  }
  0x32   :  { %s73_s16 = sshll.u32 %s6828_s15, 4  ;;  %s83_s18 = sshll.u32 %s6829_s17, 4  ;;  %s74_s16 = int_to_ptr.vmem [resolvable:$true] %s73_s16  ;;  %s84_s18 = int_to_ptr.vmem [resolvable:$true] %s83_s18 }
  0x33   :  { %s6784_s19 = scalar_lea.vmem %s74_s16, 16  ;;  %s6788_s1 = scalar_lea.vmem %s74_s16, 32 }
  0x34   :  { %p6785_p6 = scmp.ne.s32.totalorder %s74_s16, %s6784_s19  ;;  %p6789_p7 = scmp.lt.s32.totalorder %s74_s16, %s74_s16 }
  0x35   :  { %p6790_p8 = scmp.lt.s32.totalorder %s6788_s1, %s6784_s19 }
  0x37   :  { %p6791_p9 = por %p6790_p8, %p6789_p7 }
  0x39   :  { %p6792_p10 = pnand %p6791_p9, %p6785_p6 }
  0x3b   :  { %6795 = shalt.err (!%p6792_p10)
}
  0x3c   :  { %76 = dma.hbm_to_vmem [thread:$0]  %s7774_s7, 16, %s74_s16, [#allocation9]  }
  0x3d   :  { %s6804_s21 = scalar_lea.vmem %s84_s18, 16  ;;  %s6808_s5 = scalar_lea.vmem %s84_s18, 32 }
  0x3e   :  { %p6805_p11 = scmp.ne.s32.totalorder %s84_s18, %s6804_s21  ;;  %p6809_p12 = scmp.lt.s32.totalorder %s84_s18, %s84_s18 }
  0x3f   :  { %p6810_p13 = scmp.lt.s32.totalorder %s6808_s5, %s6804_s21 }
  0x41   :  { %p6811_p0 = por %p6810_p13, %p6809_p12 }
  0x43   :  { %p6812_p1 = pnand %p6811_p0, %p6805_p11 }
  0x45   :  { %6815 = shalt.err (!%p6812_p1)
}
  0x46   :  { %86 = dma.hbm_to_vmem [thread:$0]  %s7775_s8, 16, %s84_s18, [#allocation12]  }
  0x47   :  { %6816 = dma.done.wait [#allocation4], 128  }
  0x48   :  { %6817 = vsyncadd [#allocation4], 4294967168 }
  0x49   :  { %6818 = dma.done.wait [#allocation6], 32  }
  0x4a   :  { %6819 = vsyncadd [#allocation6], 4294967264 }
  0x4b   :  { %6820 = dma.done.wait [#allocation9], 32  }
  0x4c   :  { %6821 = vsyncadd [#allocation9], 4294967264 }
  0x4d   :  { %6822 = dma.done.wait [#allocation12], 16  }
  0x4e   :  { %6823 = vsyncadd [#allocation12], 4294967280  ;;  %vm123_vm0 = vcmask 64512   ;;  %v115_v1 = vld [vmem:[#allocation3] sm:$0xff]  ;;  %v113_v7 = vld [vmem:[%s7767_s0 + $0x10] sm:$0xff]  ;;  %v6830_v50 = vmov 0.0  }
  0x4f   :  { %v111_v2 = vld [vmem:[%s7767_s0] sm:$0xff]  ;;  %v112_v3 = vld [vmem:[%s7767_s0 + $0x8] sm:$0xff]  ;;  %v6916_v4 = vand.u32 4294901760, %v115_v1  ;;  %v114_v8 = vld [vmem:[%s7767_s0 + $0x18] sm:$0xff]  ;;  %v131_v11 = vsel %vm123_vm0, %v113_v7, 0  ;;  %vm6831_vm1 = vmmov 0  }
  0x50   :  { %v125_v5 = vsel %vm123_vm0, %v111_v2, 0  ;;  %v128_v6 = vsel %vm123_vm0, %v112_v3, 0  ;;  %v134_v12 = vsel %vm123_vm0, %v114_v8, 0  ;;  %v6930_v14 = vand.u32 4294901760, %v131_v11  ;;  %v110_v26 = vld [vmem:[%s7769_s2 + $0x18] sm:$0xff]  ;;  %v109_v32 = vld [vmem:[%s7769_s2 + $0x10] sm:$0xff] }
  0x51   :  { %v6924_v9 = vand.u32 4294901760, %v125_v5  ;;  %v6926_v10 = vand.u32 4294901760, %v128_v6  ;;  %5960 = vmatprep.subr.mxu0 %v6916_v4  ;;  %v274_v13 = vsub.f32 %v115_v1, %v6916_v4  ;;  %v6932_v15 = vand.u32 4294901760, %v134_v12  ;;  %v108_v39 = vld [vmem:[%s7769_s2 + $0x8] sm:$0xff]  ;;  %v107_v41 = vld [vmem:[%s7769_s2] sm:$0xff]  ;;  %s6832_s2 = smov 64  }
  0x52   :  { %5961 = vmatpush3.msra.mxu0 %v6916_v4  ;;  %v223_v19 = vsub.f32 %v131_v11, %v6930_v14  ;;  %v6946_v35 = vand.u32 4294901760, %v110_v26  ;;  %v6948_v37 = vand.u32 4294901760, %v109_v32  ;;  %v6966_v43 = vand.u32 4294901760, %v108_v39  ;;  %v5630_v60 = vld [vmem:[#allocation5] ss:$0 sm:$0xff]  ;;  %s6833_s15 = smov 32  }
  0x53   :  { %v203_v16 = vsub.f32 %v125_v5, %v6924_v9  ;;  %5970 = vmatprep.mubr.f32.mxu1 %v6924_v9  ;;  %v213_v17 = vsub.f32 %v128_v6, %v6926_v10  ;;  %v275_v18 = vand.u32 4294901760, %v274_v13  ;;  %5976 = vmatprep.subr.mxu0 %v274_v13  ;;  %v233_v20 = vsub.f32 %v134_v12, %v6932_v15 }
  0x54   :  { %v224_v24 = vand.u32 4294901760, %v223_v19  ;;  %v6956_v40 = vsub.f32 %v110_v26, %v6946_v35  ;;  %v6964_v42 = vsub.f32 %v109_v32, %v6948_v37  ;;  %v6972_v45 = vand.u32 4294901760, %v107_v41 }
  0x55   :  { %v204_v21 = vand.u32 4294901760, %v203_v16  ;;  %v214_v22 = vand.u32 4294901760, %v213_v17  ;;  %v276_v23 = vsub.f32 %v274_v13, %v275_v18  ;;  %v234_v25 = vand.u32 4294901760, %v233_v20 }
  0x56   :  { %v225_v30 = vsub.f32 %v223_v19, %v224_v24  ;;  %v6970_v44 = vand.u32 4294901760, %v6956_v40  ;;  %v6976_v46 = vand.u32 4294901760, %v6964_v42  ;;  %v6979_v47 = vsub.f32 %v108_v39, %v6966_v43 }
  0x57   :  { %v205_v27 = vsub.f32 %v203_v16, %v204_v21  ;;  %v215_v28 = vsub.f32 %v213_v17, %v214_v22  ;;  %v277_v29 = vand.u32 4294901760, %v276_v23  ;;  %v235_v31 = vsub.f32 %v233_v20, %v234_v25 }
  0x58   :  { %v226_v36 = vand.u32 4294901760, %v225_v30  ;;  %v822_v48 = vsub.f32 %v6956_v40, %v6970_v44  ;;  %v6985_v49 = vsub.f32 %v107_v41, %v6972_v45  ;;  %v829_v51 = vsub.f32 %v6964_v42, %v6976_v46 }
  0x59   :  { %v206_v33 = vand.u32 4294901760, %v205_v27  ;;  %v216_v34 = vand.u32 4294901760, %v215_v28  ;;  %5968 = vmatprep.subr.mxu1 %v277_v29  ;;  %v236_v38 = vand.u32 4294901760, %v235_v31  ;;  %v6992_v52 = vand.u32 4294901760, %v6979_v47 }
  0x5a   :  { %5969 = vmatpush3.msra.mxu1 %v277_v29  ;;  %v6996_v53 = vand.u32 4294901760, %v822_v48  ;;  %v6999_v54 = vand.u32 4294901760, %v6985_v49  ;;  %v7001_v55 = vand.u32 4294901760, %v829_v51  ;;  %vm711_vm2 = vcmask 261120  }
  0x5b   :  { %5962 = vmatprep.mubr.f32.mxu0 %v206_v33  ;;  %5971 = vmatmul.mubr.f32.vlgmr.msra.gmra.mxu1 %v6926_v10  ;;  %v836_v56 = vsub.f32 %v6979_v47, %v6992_v52  ;;  %vm4866_vm3 = vcmask 1043456   ;;  %vm5516_vm4 = vcmask 130048   ;;  %vm5617_vm5 = vcmask 7168  }
  0x5c   :  { %5963 = vmatmul.mubr.f32.vlgmr.msra.gmra.mxu0 %v216_v34  ;;  %5984 = vmatprep.subr.mxu1 %v6916_v4  ;;  %v843_v57 = vsub.f32 %v6985_v49, %v6999_v54 }
  0x5d   :  { %5977 = vmatpush3.msra.mxu0 %v274_v13  ;;  %5985 = vmatpush3.msra.mxu1 %v6916_v4  ;;  %v7015_v58 = vand.u32 4294901760, %v836_v56 }
  0x5e   :  { %5965 = vmatprep.mubr.f32.mxu0 %v226_v36  ;;  %5973 = vmatprep.mubr.f32.mxu1 %v6930_v14  ;;  %v7021_v59 = vand.u32 4294901760, %v843_v57 }
  0x5f   :  { %5992 = vmatprep.subr.mxu0 %v275_v18  ;;  %5974 = vmatmul.mubr.f32.gmra.mxu1 %v6932_v15 }
  0x60   :  { %5966 = vmatmul.mubr.f32.gmra.mxu0 %v236_v38  ;;  %5986 = vmatprep.mubr.f32.mxu1 %v204_v21 }
  0x61   :  { %5978 = vmatprep.mubr.f32.mxu0 %v203_v16  ;;  %6000 = vmatprep.subr.mxu1 %v6916_v4 }
  0x63   :  { %5987 = vmatmul.mubr.f32.vlgmr.msra.gmra.mxu1 %v214_v22 }
  0x64   :  { %5979 = vmatmul.mubr.f32.vlgmr.msra.gmra.mxu0 %v213_v17  ;;  %6001 = vmatpush3.msra.mxu1 %v6916_v4 }
  0x65   :  { %5993 = vmatpush3.msra.mxu0 %v275_v18  ;;  %5981 = vmatprep.mubr.f32.mxu0 %v223_v19 }
  0x66   :  { %5989 = vmatprep.mubr.f32.mxu1 %v224_v24  ;;  %6008 = vmatprep.subr.mxu0 %v6830_v50 }
  0x67   :  { %6019 = vmatprep.subr.mxu1 %v6830_v50  ;;  %5990 = vmatmul.mubr.f32.gmra.mxu1 %v234_v25 }
  0x68   :  { %5982 = vmatmul.mubr.f32.gmra.mxu0 %v233_v20  ;;  %6002 = vmatprep.mubr.f32.mxu1 %v6924_v9 }
  0x69   :  { %5994 = vmatprep.mubr.f32.mxu0 %v6924_v9 }
  0x6b   :  { %6003 = vmatmul.mubr.f32.vlgmr.msra.gmra.mxu1 %v6926_v10 }
  0x6c   :  { %5995 = vmatmul.mubr.f32.vlgmr.msra.gmra.mxu0 %v6926_v10  ;;  %6020 = vmatpush3.msra.mxu1 %v6996_v53 }
  0x6d   :  { %6009 = vmatpush3.msra.mxu0 %v6946_v35  ;;  %6021 = vmatprep.subr.mxu1 %v6830_v50 }
  0x6e   :  { %6010 = vmatprep.subr.mxu0 %v6830_v50  ;;  %6022 = vmatpush3.msra.mxu1 %v7001_v55 }
  0x6f   :  { %6011 = vmatpush3.msra.mxu0 %v6948_v37  ;;  %5997 = vmatprep.mubr.f32.mxu0 %v6930_v14 }
  0x70   :  { %6005 = vmatprep.mubr.f32.mxu1 %v6930_v14  ;;  %6012 = vmatprep.subr.mxu0 %v6830_v50 }
  0x71   :  { %6023 = vmatprep.subr.mxu1 %v6830_v50  ;;  %5998 = vmatmul.mubr.f32.gmra.mxu0 %v6932_v15 }
  0x72   :  { %6006 = vmatmul.mubr.f32.gmra.mxu1 %v6932_v15  ;;  %6013 = vmatpush3.msra.mxu0 %v6966_v43 }
  0x73   :  { %6024 = vmatpush3.msra.mxu1 %v7015_v58  ;;  %6014 = vmatprep.subr.mxu0 %v6830_v50 }
  0x74   :  { %6025 = vmatprep.subr.mxu1 %v6830_v50  ;;  %6015 = vmatpush3.msra.mxu0 %v6972_v45 }
  0x75   :  { %6026 = vmatpush3.msra.mxu1 %v7021_v59  ;;  %6016 = vmatprep.mubr.msk.f32.mxu0 %vm6831_vm1, %v6830_v50 }
  0x76   :  { %6027 = vmatprep.mubr.msk.f32.mxu1 %vm6831_vm1, %v6830_v50  ;;  %6030 = vmatprep.subr.mxu0 %v6830_v50 }
  0x77   :  { %6041 = vmatprep.subr.mxu1 %v6830_v50  ;;  %6017 = vmatmul.mubr.f32.vlgmr.msra.gmra.mxu0 %v6830_v50 }
  0x78   :  { %6028 = vmatmul.mubr.f32.vlgmr.msra.gmra.mxu1 %v6830_v50  ;;  %6031 = vmatpush3.msra.mxu0 %v6956_v40 }
  0x79   :  { %6042 = vmatpush3.msra.mxu1 %v6946_v35  ;;  %6032 = vmatprep.subr.mxu0 %v6830_v50 }
  0x7a   :  { %6043 = vmatprep.subr.mxu1 %v6830_v50  ;;  %6033 = vmatpush3.msra.mxu0 %v6964_v42 }
  0x7b   :  { %6044 = vmatpush3.msra.mxu1 %v6948_v37  ;;  %6034 = vmatprep.subr.mxu0 %v6830_v50 }
  0x7c   :  { %6045 = vmatprep.subr.mxu1 %v6830_v50  ;;  %6035 = vmatpush3.msra.mxu0 %v6979_v47 }
  0x7d   :  { %6046 = vmatpush3.msra.mxu1 %v6966_v43  ;;  %6036 = vmatprep.subr.mxu0 %v6830_v50 }
  0x7e   :  { %6047 = vmatprep.subr.mxu1 %v6830_v50  ;;  %6037 = vmatpush3.msra.mxu0 %v6985_v49 }
  0x7f   :  { %6038 = vmatprep.mubr.msk.f32.mxu0 %vm6831_vm1, %v6830_v50  ;;  %6048 = vmatpush3.msra.mxu1 %v6972_v45 }
  0x80   :  { %6039 = vmatmul.mubr.f32.vlgmr.msra.gmra.mxu0 %v6830_v50  ;;  %6049 = vmatprep.mubr.msk.f32.mxu1 %vm6831_vm1, %v6830_v50 }
  0x81   :  { %6052 = vmatprep.subr.mxu0 %v6830_v50  ;;  %6063 = vmatprep.subr.mxu1 %v6830_v50 }
  0x82   :  { %6050 = vmatmul.mubr.f32.vlgmr.msra.gmra.mxu1 %v6830_v50  ;;  %6053 = vmatpush3.msra.mxu0 %v6970_v44 }
  0x83   :  { %6064 = vmatpush3.msra.mxu1 %v6946_v35  ;;  %6054 = vmatprep.subr.mxu0 %v6830_v50 }
  0x84   :  { %6065 = vmatprep.subr.mxu1 %v6830_v50  ;;  %6055 = vmatpush3.msra.mxu0 %v6976_v46 }
  0x85   :  { %6066 = vmatpush3.msra.mxu1 %v6948_v37  ;;  %6056 = vmatprep.subr.mxu0 %v6830_v50 }
  0x86   :  { %6067 = vmatprep.subr.mxu1 %v6830_v50  ;;  %6057 = vmatpush3.msra.mxu0 %v6992_v52 }
  0x87   :  { %6068 = vmatpush3.msra.mxu1 %v6966_v43  ;;  %6058 = vmatprep.subr.mxu0 %v6830_v50 }
  0x88   :  { %6069 = vmatprep.subr.mxu1 %v6830_v50  ;;  %6059 = vmatpush3.msra.mxu0 %v6999_v54 }
  0x89   :  { %6060 = vmatprep.mubr.msk.f32.mxu0 %vm6831_vm1, %v6830_v50  ;;  %6070 = vmatpush3.msra.mxu1 %v6972_v45 }
  0x8a   :  { %6071 = vmatprep.mubr.msk.f32.mxu1 %vm6831_vm1, %v6830_v50  ;;  %6061 = vmatmul.mubr.f32.vlgmr.msra.gmra.mxu0 %v6830_v50 }
  0x8b   :  { %6072 = vmatmul.mubr.f32.vlgmr.msra.gmra.mxu1 %v6830_v50  ;;  %6085 = vmatprep.subr.mxu1 %v6830_v50 }
  0x8c   :  { %6074 = vmatprep.subr.mxu0 %v6830_v50  ;;  %6086 = vmatpush3.msra.mxu1 %v6996_v53 }
  0x8d   :  { %6093 = vmatprep.mubr.msk.f32.mxu1 %vm6831_vm1, %v6830_v50  ;;  %6087 = vmatprep.subr.mxu1 %v6830_v50 }
  0x8e   :  { %6075 = vmatpush3.msra.mxu0 %v6946_v35  ;;  %6088 = vmatpush3.msra.mxu1 %v7001_v55 }
  0x8f   :  { %6076 = vmatprep.subr.mxu0 %v6830_v50  ;;  %6089 = vmatprep.subr.mxu1 %v6830_v50 }
  0x90   :  { %6077 = vmatpush3.msra.mxu0 %v6948_v37  ;;  %6090 = vmatpush3.msra.mxu1 %v7015_v58 }
  0x91   :  { %6078 = vmatprep.subr.mxu0 %v6830_v50  ;;  %6091 = vmatprep.subr.mxu1 %v6830_v50 }
  0x92   :  { %6079 = vmatpush3.msra.mxu0 %v6966_v43  ;;  %6092 = vmatpush3.msra.mxu1 %v7021_v59 }
  0x93   :  { %6080 = vmatprep.subr.mxu0 %v6830_v50  ;;  %6107 = vmatprep.subr.mxu1 %v6830_v50 }
  0x94   :  { %6081 = vmatpush3.msra.mxu0 %v6972_v45  ;;  %6082 = vmatprep.mubr.msk.f32.mxu0 %vm6831_vm1, %v6830_v50 }
  0x95   :  { %6096 = vmatprep.subr.mxu0 %v6830_v50 }
 0x11b   :  { %v5972_v62 = vpop.f32.mrf.mxu1 }
 0x11c   :  { %v5964_v61 = vpop.f32.mrf.mxu0 }
 0x11d   :  { %v219_v63 = vadd.f32 %v5964_v61, %v5630_v60  ;;  %v314_v1 = vpop.f32.mrf.mxu1 }
 0x11e   :  { %v208_v0 = vpop.f32.mrf.mxu0 }
 0x11f   :  { %v321_v2 = vadd.f32 %v5972_v62, %v219_v63  ;;  %v5975_v4 = vpop.f32.mrf.mxu1  ;;  %v209_v61 = vadd.f32 %v5630_v60, %v208_v0 }
 0x120   :  { %v5967_v3 = vpop.f32.mrf.mxu0 }
 0x121   :  { %v239_v5 = vadd.f32 %v5967_v3, %v5630_v60  ;;  %v326_v7 = vpop.f32.mrf.mxu1  ;;  %v315_v63 = vadd.f32 %v314_v1, %v209_v61 }
 0x122   :  { %v228_v6 = vpop.f32.mrf.mxu0 }
 0x123   :  { %v333_v8 = vadd.f32 %v5975_v4, %v239_v5  ;;  %v229_v9 = vadd.f32 %v5630_v60, %v228_v6  ;;  %v5988_v11 = vpop.f32.mrf.mxu1 }
 0x124   :  { %v5980_v10 = vpop.f32.mrf.mxu0 }
 0x125   :  { %v327_v12 = vadd.f32 %v326_v7, %v229_v9  ;;  %v414_v13 = vadd.f32 %v5980_v10, %v321_v2  ;;  %v501_v15 = vpop.f32.mrf.mxu1 }
 0x126   :  { %v406_v14 = vpop.f32.mrf.mxu0 }
 0x127   :  { %v510_v16 = vadd.f32 %v5988_v11, %v414_v13  ;;  %v5991_v18 = vpop.f32.mrf.mxu1  ;;  %v407_v4 = vadd.f32 %v406_v14, %v315_v63 }
 0x128   :  { %v5983_v17 = vpop.f32.mrf.mxu0 }
 0x129   :  { %v428_v19 = vadd.f32 %v5983_v17, %v333_v8  ;;  %v517_v21 = vpop.f32.mrf.mxu1  ;;  %v502_v8 = vadd.f32 %v501_v15, %v407_v4 }
 0x12a   :  { %v420_v20 = vpop.f32.mrf.mxu0 }
 0x12b   :  { %v526_v22 = vadd.f32 %v5991_v18, %v428_v19  ;;  %v421_v23 = vadd.f32 %v420_v20, %v327_v12  ;;  %v6004_v25 = vpop.f32.mrf.mxu1 }
 0x12c   :  { %v5996_v24 = vpop.f32.mrf.mxu0 }
 0x12d   :  { %v518_v26 = vadd.f32 %v517_v21, %v421_v23  ;;  %v606_v27 = vadd.f32 %v5996_v24, %v510_v16  ;;  %v689_v29 = vpop.f32.mrf.mxu1 }
 0x12e   :  { %v599_v28 = vpop.f32.mrf.mxu0 }
 0x12f   :  { %v7103_v30 = vadd.f32 %v6004_v25, %v606_v27  ;;  %v600_v9 = vadd.f32 %v599_v28, %v502_v8 }
 0x131   :  { %v5999_v31 = vpop.f32.mrf.mxu0  ;;  %v7109_v18 = vadd.f32 %v689_v29, %v600_v9 }
 0x132   :  { %v6007_v32 = vpop.f32.mrf.mxu1  ;;  %v618_v33 = vadd.f32 %v5999_v31, %v526_v22 }
 0x133   :  { %v611_v34 = vpop.f32.mrf.mxu0 }
 0x134   :  { %v701_v36 = vpop.f32.mrf.mxu1  ;;  %v7105_v38 = vadd.f32 %v6007_v32, %v618_v33  ;;  %v612_v39 = vadd.f32 %v611_v34, %v518_v26 }
 0x136   :  { %v7107_v41 = vadd.f32 %v701_v36, %v612_v39 }
 0x137   :  { %v790_v48 = vpop.f32.mrf.mxu0 }
 0x138   :  { %v881_v51 = vpop.f32.mrf.mxu1 }
 0x139   :  { %v6018_v56 = vpop.f32.mrf.mxu0  ;;  %v882_v5 = vadd.f32 %v881_v51, %v790_v48 }
 0x13a   :  { %v6029_v57 = vpop.f32.mrf.mxu1 }
 0x140   :  { %v961_v62 = vpop.f32.mrf.mxu0 }
 0x141   :  { %v962_v7 = vadd.f32 %v961_v62, %v882_v5 }
 0x142   :  { %v1038_v2 = vpop.f32.mrf.mxu1  ;;  %v6040_v3 = vpop.f32.mrf.mxu0 }
 0x143   :  { %v1039_v10 = vadd.f32 %v1038_v2, %v962_v7 }
 0x144   :  { %v6051_v6 = vpop.f32.mrf.mxu1 }
 0x14a   :  { %v1121_v11 = vpop.f32.mrf.mxu0 }
 0x14b   :  { %v1196_v12 = vpop.f32.mrf.mxu1  ;;  %v1122_v13 = vadd.f32 %v1121_v11, %v1039_v10 }
 0x14c   :  { %v6062_v16 = vpop.f32.mrf.mxu0 }
 0x14d   :  { %v6073_v17 = vpop.f32.mrf.mxu1  ;;  %v1197_v19 = vadd.f32 %v1196_v12, %v1122_v13 }
 0x14f   :  { %v1200_v60 = vadd.f32 %v1197_v19, %v7109_v18 }
 0x151   :  { %6630 = vtanh.f32 %v1200_v60  ;;  %v5631_v1 = vmul.f32 -1.442695, %v1200_v60 }
 0x153   :  { %6632 = vpow2.f32 %v5631_v1 }
 0x15e   :  { %v6631_v0 = vpop.eup %6630 }
 0x15f   :  { %1210 = vrot.lane.b32.xlu0 %v6631_v0, %s6832_s2 }
 0x160   :  { %v6633_v14 = vpop.eup %6632 }
 0x161   :  { %v1204_v15 = vadd.f32 1.0, %v6633_v14 }
 0x163   :  { %6634 = vrcp.f32 %v1204_v15 }
 0x170   :  { %v6635_v20 = vpop.eup %6634 }
 0x171   :  { %v1208_v23 = vmul.f32 0.0, %v6635_v20 }
 0x1d1   :  { %v1211_v21 = vpop.permute.xlu0 %1210 }
 0x1d2   :  { %v1213_v22 = vmul.f32 %v6635_v20, %v1211_v21 }
 0x1d4   :  { %1215 = vrot.lane.b32.xlu0 %v1213_v22, %s6833_s15 }
 0x246   :  { %v1216_v24 = vpop.permute.xlu0 %1215 }
 0x247   :  { %v7114_v25 = vadd.f32 %v1216_v24, %v1208_v23 }
 0x249   :  { %6636 = vtanh.f32 %v7114_v25  ;;  %v1727_v15 = vrot.slane %v7114_v25, 4 }
 0x256   :  { %v6637_v26 = vpop.eup %6636 }
 0x257   :  { %1221 = vrot.lane.b32.xlu1 %v6637_v26, %s6832_s2 }
 0x2c9   :  { %v1222_v27 = vpop.permute.xlu1 %1221 }
 0x2ca   :  { %v7118_v28 = vmul.f32 %v6635_v20, %v1222_v27 }
 0x2cc   :  { %1226 = vrot.lane.b32.xlu1 %v7118_v28, %s6833_s15 }
 0x33e   :  { %v1227_v29 = vpop.permute.xlu1 %1226 }
 0x33f   :  { %v1228_v31 = vsel %vm711_vm2, %v1227_v29, 0 }
 0x340   :  { %v1299_v32 = vand.u32 4294901760, %v1228_v31 }
 0x342   :  { %v1300_v33 = vsub.f32 %v1228_v31, %v1299_v32  ;;  %6094 = vmatmul.mubr.f32.vlgmr.msra.gmra.mxu1 %v1299_v32 }
 0x343   :  { %6108 = vmatpush3.msra.mxu1 %v6946_v35  ;;  %6115 = vmatprep.mubr.msk.f32.mxu1 %vm6831_vm1, %v6830_v50 }
 0x344   :  { %v1301_v34 = vand.u32 4294901760, %v1300_v33  ;;  %6109 = vmatprep.subr.mxu1 %v6830_v50 }
 0x345   :  { %6110 = vmatpush3.msra.mxu1 %v6948_v37 }
 0x346   :  { %v1302_v36 = vsub.f32 %v1300_v33, %v1301_v34  ;;  %6111 = vmatprep.subr.mxu1 %v6830_v50 }
 0x347   :  { %6112 = vmatpush3.msra.mxu1 %v6966_v43 }
 0x348   :  { %v1303_v39 = vand.u32 4294901760, %v1302_v36  ;;  %6113 = vmatprep.subr.mxu1 %v6830_v50 }
 0x349   :  { %6114 = vmatpush3.msra.mxu1 %v6972_v45 }
 0x34a   :  { %6116 = vmatmul.mubr.f32.vlgmr.msra.gmra.mxu1 %v1301_v34  ;;  %6129 = vmatprep.subr.mxu1 %v6830_v50 }
 0x34b   :  { %6083 = vmatmul.mubr.f32.vlgmr.msra.gmra.mxu0 %v1303_v39  ;;  %6130 = vmatpush3.msra.mxu1 %v6946_v35 }
 0x34c   :  { %6097 = vmatpush3.msra.mxu0 %v6956_v40  ;;  %6131 = vmatprep.subr.mxu1 %v6830_v50 }
 0x34d   :  { %6098 = vmatprep.subr.mxu0 %v6830_v50  ;;  %6132 = vmatpush3.msra.mxu1 %v6948_v37 }
 0x34e   :  { %6099 = vmatpush3.msra.mxu0 %v6964_v42  ;;  %6133 = vmatprep.subr.mxu1 %v6830_v50 }
 0x34f   :  { %6100 = vmatprep.subr.mxu0 %v6830_v50  ;;  %6134 = vmatpush3.msra.mxu1 %v6966_v43 }
 0x350   :  { %6101 = vmatpush3.msra.mxu0 %v6979_v47  ;;  %6135 = vmatprep.subr.mxu1 %v6830_v50 }
 0x351   :  { %6102 = vmatprep.subr.mxu0 %v6830_v50  ;;  %6104 = vmatprep.mubr.msk.f32.mxu0 %vm6831_vm1, %v6830_v50 }
 0x352   :  { %6103 = vmatpush3.msra.mxu0 %v6985_v49  ;;  %6136 = vmatpush3.msra.mxu1 %v6972_v45 }
 0x353   :  { %6137 = vmatprep.mubr.msk.f32.mxu1 %vm6831_vm1, %v6830_v50  ;;  %6105 = vmatmul.mubr.f32.vlgmr.msra.gmra.mxu0 %v1300_v33 }
 0x354   :  { %6118 = vmatprep.subr.mxu0 %v6830_v50  ;;  %6138 = vmatmul.mubr.f32.vlgmr.msra.gmra.mxu1 %v1299_v32 }
 0x355   :  { %6119 = vmatpush3.msra.mxu0 %v6970_v44  ;;  %6126 = vmatprep.mubr.msk.f32.mxu0 %vm6831_vm1, %v6830_v50 }
 0x356   :  { %6120 = vmatprep.subr.mxu0 %v6830_v50  ;;  %6151 = vmatprep.subr.mxu1 %v6830_v50 }
 0x357   :  { %6121 = vmatpush3.msra.mxu0 %v6976_v46  ;;  %6152 = vmatpush3.msra.mxu1 %v6996_v53 }
 0x358   :  { %6122 = vmatprep.subr.mxu0 %v6830_v50  ;;  %6153 = vmatprep.subr.mxu1 %v6830_v50 }
 0x359   :  { %6123 = vmatpush3.msra.mxu0 %v6992_v52  ;;  %6154 = vmatpush3.msra.mxu1 %v7001_v55 }
 0x35a   :  { %6124 = vmatprep.subr.mxu0 %v6830_v50  ;;  %6155 = vmatprep.subr.mxu1 %v6830_v50 }
 0x35b   :  { %6125 = vmatpush3.msra.mxu0 %v6999_v54  ;;  %6156 = vmatpush3.msra.mxu1 %v7015_v58 }
 0x35c   :  { %6127 = vmatmul.mubr.f32.vlgmr.msra.gmra.mxu0 %v1299_v32  ;;  %6157 = vmatprep.subr.mxu1 %v6830_v50 }
 0x35d   :  { %6158 = vmatpush3.msra.mxu1 %v7021_v59  ;;  %6140 = vmatprep.subr.mxu0 %v6830_v50 }
 0x35e   :  { %6159 = vmatprep.mubr.msk.f32.mxu1 %vm6831_vm1, %v6830_v50  ;;  %6173 = vmatprep.subr.mxu1 %v6830_v50 }
 0x35f   :  { %6141 = vmatpush3.msra.mxu0 %v6946_v35  ;;  %6148 = vmatprep.mubr.msk.f32.mxu0 %vm6831_vm1, %v6830_v50 }
 0x360   :  { %6142 = vmatprep.subr.mxu0 %v6830_v50 }
 0x361   :  { %6143 = vmatpush3.msra.mxu0 %v6948_v37 }
 0x362   :  { %6144 = vmatprep.subr.mxu0 %v6830_v50 }
 0x363   :  { %6145 = vmatpush3.msra.mxu0 %v6966_v43 }
 0x364   :  { %6146 = vmatprep.subr.mxu0 %v6830_v50 }
 0x365   :  { %6147 = vmatpush3.msra.mxu0 %v6972_v45 }
 0x366   :  { %6162 = vmatprep.subr.mxu0 %v6830_v50 }
 0x402   :  { %v1396_v48 = vpop.f32.mrf.mxu1 }
 0x404   :  { %v6095_v51 = vpop.f32.mrf.mxu1 }
 0x40a   :  { %v1553_v56 = vpop.f32.mrf.mxu1 }
 0x40b   :  { %v1305_v57 = vpop.f32.mrf.mxu0 }
 0x40c   :  { %v6117_v61 = vpop.f32.mrf.mxu1  ;;  %v1397_v3 = vadd.f32 %v1396_v48, %v1305_v57 }
 0x40d   :  { %v6084_v62 = vpop.f32.mrf.mxu0 }
 0x413   :  { %v1476_v63 = vpop.f32.mrf.mxu0 }
 0x414   :  { %v1711_v2 = vpop.f32.mrf.mxu1  ;;  %v1477_v6 = vadd.f32 %v1476_v63, %v1397_v3 }
 0x415   :  { %v6106_v4 = vpop.f32.mrf.mxu0 }
 0x416   :  { %v6139_v5 = vpop.f32.mrf.mxu1  ;;  %v1554_v7 = vadd.f32 %v1553_v56, %v1477_v6 }
 0x41c   :  { %v1636_v8 = vpop.f32.mrf.mxu0 }
 0x41d   :  { %v1637_v9 = vadd.f32 %v1636_v8, %v1554_v7 }
 0x41e   :  { %v6128_v10 = vpop.f32.mrf.mxu0 }
 0x41f   :  { %v1712_v11 = vadd.f32 %v1711_v2, %v1637_v9 }
 0x421   :  { %v1716_v12 = vrot.slane %v1712_v11, 4 }
 0x423   :  { %v1718_v13 = vadd.f32 %v1716_v12, %v7109_v18 }
 0x425   :  { %6638 = vtanh.f32 %v1718_v13  ;;  %v5632_v17 = vmul.f32 -1.442695, %v1718_v13 }
 0x427   :  { %6640 = vpow2.f32 %v5632_v17 }
 0x432   :  { %v6639_v16 = vpop.eup %6638 }
 0x433   :  { %1731 = vrot.lane.b32.xlu0 %v6639_v16, %s6832_s2 }
 0x434   :  { %v6641_v19 = vpop.eup %6640 }
 0x435   :  { %v1722_v60 = vadd.f32 1.0, %v6641_v19 }
 0x437   :  { %6642 = vrcp.f32 %v1722_v60 }
 0x444   :  { %v6643_v0 = vpop.eup %6642 }
 0x445   :  { %v1729_v20 = vmul.f32 %v6643_v0, %v1727_v15 }
 0x4a5   :  { %v1732_v1 = vpop.permute.xlu0 %1731 }
 0x4a6   :  { %v1734_v14 = vmul.f32 %v6643_v0, %v1732_v1 }
 0x4a8   :  { %1736 = vrot.lane.b32.xlu1 %v1734_v14, %s6833_s15 }
 0x51a   :  { %v1737_v21 = vpop.permute.xlu1 %1736 }
 0x51b   :  { %v7187_v22 = vadd.f32 %v1737_v21, %v1729_v20 }
 0x51d   :  { %6644 = vtanh.f32 %v7187_v22 }
 0x52a   :  { %v6645_v18 = vpop.eup %6644 }
 0x52b   :  { %1742 = vrot.lane.b32.xlu0 %v6645_v18, %s6832_s2 }
 0x59d   :  { %v1743_v23 = vpop.permute.xlu0 %1742 }
 0x59e   :  { %v7191_v24 = vmul.f32 %v6643_v0, %v1743_v23  ;;  %v2246_v0 = vrot.slane %v7187_v22, 4 }
 0x5a0   :  { %v1747_v26 = vrot.slane %v7191_v24, 4 }
 0x5a2   :  { %1748 = vrot.lane.b32.xlu1 %v1747_v26, %s6833_s15 }
 0x614   :  { %v1749_v27 = vpop.permute.xlu1 %1748 }
 0x615   :  { %v1750_v29 = vsel %vm711_vm2, %v1749_v27, 0 }
 0x616   :  { %v1821_v25 = vand.u32 4294901760, %v1750_v29 }
 0x618   :  { %v1822_v31 = vsub.f32 %v1750_v29, %v1821_v25  ;;  %6160 = vmatmul.mubr.f32.vlgmr.msra.gmra.mxu1 %v1821_v25 }
 0x619   :  { %6174 = vmatpush3.msra.mxu1 %v6946_v35  ;;  %6181 = vmatprep.mubr.msk.f32.mxu1 %vm6831_vm1, %v6830_v50 }
 0x61a   :  { %v1823_v32 = vand.u32 4294901760, %v1822_v31  ;;  %6175 = vmatprep.subr.mxu1 %v6830_v50 }
 0x61b   :  { %6176 = vmatpush3.msra.mxu1 %v6948_v37 }
 0x61c   :  { %v1824_v33 = vsub.f32 %v1822_v31, %v1823_v32  ;;  %6177 = vmatprep.subr.mxu1 %v6830_v50 }
 0x61d   :  { %6178 = vmatpush3.msra.mxu1 %v6966_v43 }
 0x61e   :  { %v1825_v34 = vand.u32 4294901760, %v1824_v33  ;;  %6179 = vmatprep.subr.mxu1 %v6830_v50 }
 0x61f   :  { %6180 = vmatpush3.msra.mxu1 %v6972_v45 }
 0x620   :  { %6182 = vmatmul.mubr.f32.vlgmr.msra.gmra.mxu1 %v1823_v32  ;;  %6195 = vmatprep.subr.mxu1 %v6830_v50 }
 0x621   :  { %6149 = vmatmul.mubr.f32.vlgmr.msra.gmra.mxu0 %v1825_v34  ;;  %6196 = vmatpush3.msra.mxu1 %v6946_v35 }
 0x622   :  { %6163 = vmatpush3.msra.mxu0 %v6956_v40  ;;  %6197 = vmatprep.subr.mxu1 %v6830_v50 }
 0x623   :  { %6164 = vmatprep.subr.mxu0 %v6830_v50  ;;  %6198 = vmatpush3.msra.mxu1 %v6948_v37 }
 0x624   :  { %6165 = vmatpush3.msra.mxu0 %v6964_v42  ;;  %6199 = vmatprep.subr.mxu1 %v6830_v50 }
 0x625   :  { %6166 = vmatprep.subr.mxu0 %v6830_v50  ;;  %6200 = vmatpush3.msra.mxu1 %v6966_v43 }
 0x626   :  { %6167 = vmatpush3.msra.mxu0 %v6979_v47  ;;  %6201 = vmatprep.subr.mxu1 %v6830_v50 }
 0x627   :  { %6168 = vmatprep.subr.mxu0 %v6830_v50  ;;  %6170 = vmatprep.mubr.msk.f32.mxu0 %vm6831_vm1, %v6830_v50 }
 0x628   :  { %6169 = vmatpush3.msra.mxu0 %v6985_v49  ;;  %6202 = vmatpush3.msra.mxu1 %v6972_v45 }
 0x629   :  { %6203 = vmatprep.mubr.msk.f32.mxu1 %vm6831_vm1, %v6830_v50  ;;  %6171 = vmatmul.mubr.f32.vlgmr.msra.gmra.mxu0 %v1822_v31 }
 0x62a   :  { %6184 = vmatprep.subr.mxu0 %v6830_v50  ;;  %6204 = vmatmul.mubr.f32.vlgmr.msra.gmra.mxu1 %v1821_v25 }
 0x62b   :  { %6185 = vmatpush3.msra.mxu0 %v6970_v44  ;;  %6192 = vmatprep.mubr.msk.f32.mxu0 %vm6831_vm1, %v6830_v50 }
 0x62c   :  { %6186 = vmatprep.subr.mxu0 %v6830_v50  ;;  %6217 = vmatprep.subr.mxu1 %v6830_v50 }
 0x62d   :  { %6187 = vmatpush3.msra.mxu0 %v6976_v46  ;;  %6218 = vmatpush3.msra.mxu1 %v6996_v53 }
 0x62e   :  { %6188 = vmatprep.subr.mxu0 %v6830_v50  ;;  %6219 = vmatprep.subr.mxu1 %v6830_v50 }
 0x62f   :  { %6189 = vmatpush3.msra.mxu0 %v6992_v52  ;;  %6220 = vmatpush3.msra.mxu1 %v7001_v55 }
 0x630   :  { %6190 = vmatprep.subr.mxu0 %v6830_v50  ;;  %6221 = vmatprep.subr.mxu1 %v6830_v50 }
 0x631   :  { %6191 = vmatpush3.msra.mxu0 %v6999_v54  ;;  %6222 = vmatpush3.msra.mxu1 %v7015_v58 }
 0x632   :  { %6193 = vmatmul.mubr.f32.vlgmr.msra.gmra.mxu0 %v1821_v25  ;;  %6223 = vmatprep.subr.mxu1 %v6830_v50 }
 0x633   :  { %6224 = vmatpush3.msra.mxu1 %v7021_v59  ;;  %6206 = vmatprep.subr.mxu0 %v6830_v50 }
 0x634   :  { %6225 = vmatprep.mubr.msk.f32.mxu1 %vm6831_vm1, %v6830_v50  ;;  %6239 = vmatprep.subr.mxu1 %v6830_v50 }
 0x635   :  { %6207 = vmatpush3.msra.mxu0 %v6946_v35  ;;  %6214 = vmatprep.mubr.msk.f32.mxu0 %vm6831_vm1, %v6830_v50 }
 0x636   :  { %6208 = vmatprep.subr.mxu0 %v6830_v50 }
 0x637   :  { %6209 = vmatpush3.msra.mxu0 %v6948_v37 }
 0x638   :  { %6210 = vmatprep.subr.mxu0 %v6830_v50 }
 0x639   :  { %6211 = vmatpush3.msra.mxu0 %v6966_v43 }
 0x63a   :  { %6212 = vmatprep.subr.mxu0 %v6830_v50 }
 0x63b   :  { %6213 = vmatpush3.msra.mxu0 %v6972_v45 }
 0x63c   :  { %6228 = vmatprep.subr.mxu0 %v6830_v50 }
 0x6d8   :  { %v1918_v36 = vpop.f32.mrf.mxu1 }
 0x6da   :  { %v6161_v39 = vpop.f32.mrf.mxu1 }
 0x6e0   :  { %v2075_v48 = vpop.f32.mrf.mxu1 }
 0x6e1   :  { %v1827_v51 = vpop.f32.mrf.mxu0 }
 0x6e2   :  { %v6183_v56 = vpop.f32.mrf.mxu1  ;;  %v1919_v63 = vadd.f32 %v1918_v36, %v1827_v51 }
 0x6e3   :  { %v6150_v57 = vpop.f32.mrf.mxu0 }
 0x6e9   :  { %v1998_v61 = vpop.f32.mrf.mxu0 }
 0x6ea   :  { %v2233_v62 = vpop.f32.mrf.mxu1  ;;  %v1999_v4 = vadd.f32 %v1998_v61, %v1919_v63 }
 0x6eb   :  { %v6172_v2 = vpop.f32.mrf.mxu0 }
 0x6ec   :  { %v6205_v3 = vpop.f32.mrf.mxu1  ;;  %v2076_v5 = vadd.f32 %v2075_v48, %v1999_v4 }
 0x6f2   :  { %v2158_v6 = vpop.f32.mrf.mxu0 }
 0x6f3   :  { %v2159_v7 = vadd.f32 %v2158_v6, %v2076_v5 }
 0x6f4   :  { %v6194_v8 = vpop.f32.mrf.mxu0 }
 0x6f5   :  { %v2234_v9 = vadd.f32 %v2233_v62, %v2159_v7 }
 0x6f7   :  { %v2237_v10 = vadd.f32 %v2234_v9, %v7103_v30 }
 0x6f9   :  { %6646 = vtanh.f32 %v2237_v10  ;;  %v5633_v12 = vmul.f32 -1.442695, %v2237_v10 }
 0x6fb   :  { %6648 = vpow2.f32 %v5633_v12 }
 0x706   :  { %v6647_v11 = vpop.eup %6646 }
 0x707   :  { %2250 = vrot.lane.b32.xlu0 %v6647_v11, %s6832_s2 }
 0x708   :  { %v6649_v13 = vpop.eup %6648 }
 0x709   :  { %v2241_v16 = vadd.f32 1.0, %v6649_v13 }
 0x70b   :  { %6650 = vrcp.f32 %v2241_v16 }
 0x718   :  { %v6651_v17 = vpop.eup %6650 }
 0x719   :  { %v2248_v1 = vmul.f32 %v6651_v17, %v2246_v0 }
 0x779   :  { %v2251_v19 = vpop.permute.xlu0 %2250 }
 0x77a   :  { %v2253_v60 = vmul.f32 %v6651_v17, %v2251_v19 }
 0x77c   :  { %2255 = vrot.lane.b32.xlu1 %v2253_v60, %s6833_s15 }
 0x7ee   :  { %v2256_v14 = vpop.permute.xlu1 %2255 }
 0x7ef   :  { %v7260_v15 = vadd.f32 %v2256_v14, %v2248_v1 }
 0x7f1   :  { %6652 = vtanh.f32 %v7260_v15  ;;  %v2767_v19 = vrot.slane %v7260_v15, 4 }
 0x7fe   :  { %v6653_v20 = vpop.eup %6652 }
 0x7ff   :  { %2261 = vrot.lane.b32.xlu0 %v6653_v20, %s6832_s2 }
 0x871   :  { %v2262_v21 = vpop.permute.xlu0 %2261 }
 0x872   :  { %v7264_v18 = vmul.f32 %v6651_v17, %v2262_v21 }
 0x874   :  { %2266 = vrot.lane.b32.xlu1 %v7264_v18, %s6833_s15 }
 0x8e6   :  { %v2267_v23 = vpop.permute.xlu1 %2266 }
 0x8e7   :  { %v2268_v26 = vsel %vm711_vm2, %v2267_v23, 0 }
 0x8e8   :  { %v2339_v27 = vand.u32 4294901760, %v2268_v26 }
 0x8ea   :  { %v2340_v22 = vsub.f32 %v2268_v26, %v2339_v27  ;;  %6226 = vmatmul.mubr.f32.vlgmr.msra.gmra.mxu1 %v2339_v27 }
 0x8eb   :  { %6240 = vmatpush3.msra.mxu1 %v6946_v35  ;;  %6247 = vmatprep.mubr.msk.f32.mxu1 %vm6831_vm1, %v6830_v50 }
 0x8ec   :  { %v2341_v29 = vand.u32 4294901760, %v2340_v22  ;;  %6241 = vmatprep.subr.mxu1 %v6830_v50 }
 0x8ed   :  { %6242 = vmatpush3.msra.mxu1 %v6948_v37 }
 0x8ee   :  { %v2342_v25 = vsub.f32 %v2340_v22, %v2341_v29  ;;  %6243 = vmatprep.subr.mxu1 %v6830_v50 }
 0x8ef   :  { %6244 = vmatpush3.msra.mxu1 %v6966_v43 }
 0x8f0   :  { %v2343_v31 = vand.u32 4294901760, %v2342_v25  ;;  %6245 = vmatprep.subr.mxu1 %v6830_v50 }
 0x8f1   :  { %6246 = vmatpush3.msra.mxu1 %v6972_v45 }
 0x8f2   :  { %6248 = vmatmul.mubr.f32.vlgmr.msra.gmra.mxu1 %v2341_v29  ;;  %6261 = vmatprep.subr.mxu1 %v6830_v50 }
 0x8f3   :  { %6215 = vmatmul.mubr.f32.vlgmr.msra.gmra.mxu0 %v2343_v31  ;;  %6262 = vmatpush3.msra.mxu1 %v6946_v35 }
 0x8f4   :  { %6229 = vmatpush3.msra.mxu0 %v6956_v40  ;;  %6263 = vmatprep.subr.mxu1 %v6830_v50 }
 0x8f5   :  { %6230 = vmatprep.subr.mxu0 %v6830_v50  ;;  %6264 = vmatpush3.msra.mxu1 %v6948_v37 }
 0x8f6   :  { %6231 = vmatpush3.msra.mxu0 %v6964_v42  ;;  %6265 = vmatprep.subr.mxu1 %v6830_v50 }
 0x8f7   :  { %6232 = vmatprep.subr.mxu0 %v6830_v50  ;;  %6266 = vmatpush3.msra.mxu1 %v6966_v43 }
 0x8f8   :  { %6233 = vmatpush3.msra.mxu0 %v6979_v47  ;;  %6267 = vmatprep.subr.mxu1 %v6830_v50 }
 0x8f9   :  { %6234 = vmatprep.subr.mxu0 %v6830_v50  ;;  %6236 = vmatprep.mubr.msk.f32.mxu0 %vm6831_vm1, %v6830_v50 }
 0x8fa   :  { %6235 = vmatpush3.msra.mxu0 %v6985_v49  ;;  %6268 = vmatpush3.msra.mxu1 %v6972_v45 }
 0x8fb   :  { %6269 = vmatprep.mubr.msk.f32.mxu1 %vm6831_vm1, %v6830_v50  ;;  %6237 = vmatmul.mubr.f32.vlgmr.msra.gmra.mxu0 %v2340_v22 }
 0x8fc   :  { %6250 = vmatprep.subr.mxu0 %v6830_v50  ;;  %6270 = vmatmul.mubr.f32.vlgmr.msra.gmra.mxu1 %v2339_v27 }
 0x8fd   :  { %6251 = vmatpush3.msra.mxu0 %v6970_v44  ;;  %6258 = vmatprep.mubr.msk.f32.mxu0 %vm6831_vm1, %v6830_v50 }
 0x8fe   :  { %6252 = vmatprep.subr.mxu0 %v6830_v50  ;;  %6283 = vmatprep.subr.mxu1 %v6830_v50 }
 0x8ff   :  { %6253 = vmatpush3.msra.mxu0 %v6976_v46  ;;  %6284 = vmatpush3.msra.mxu1 %v6996_v53 }
 0x900   :  { %6254 = vmatprep.subr.mxu0 %v6830_v50  ;;  %6285 = vmatprep.subr.mxu1 %v6830_v50 }
 0x901   :  { %6255 = vmatpush3.msra.mxu0 %v6992_v52  ;;  %6286 = vmatpush3.msra.mxu1 %v7001_v55 }
 0x902   :  { %6256 = vmatprep.subr.mxu0 %v6830_v50  ;;  %6287 = vmatprep.subr.mxu1 %v6830_v50 }
 0x903   :  { %6257 = vmatpush3.msra.mxu0 %v6999_v54  ;;  %6288 = vmatpush3.msra.mxu1 %v7015_v58 }
 0x904   :  { %6259 = vmatmul.mubr.f32.vlgmr.msra.gmra.mxu0 %v2339_v27  ;;  %6289 = vmatprep.subr.mxu1 %v6830_v50 }
 0x905   :  { %6290 = vmatpush3.msra.mxu1 %v7021_v59  ;;  %6272 = vmatprep.subr.mxu0 %v6830_v50 }
 0x906   :  { %6291 = vmatprep.mubr.msk.f32.mxu1 %vm6831_vm1, %v6830_v50  ;;  %6305 = vmatprep.subr.mxu1 %v6830_v50 }
 0x907   :  { %6273 = vmatpush3.msra.mxu0 %v6946_v35  ;;  %6280 = vmatprep.mubr.msk.f32.mxu0 %vm6831_vm1, %v6830_v50 }
 0x908   :  { %6274 = vmatprep.subr.mxu0 %v6830_v50 }
 0x909   :  { %6275 = vmatpush3.msra.mxu0 %v6948_v37 }
 0x90a   :  { %6276 = vmatprep.subr.mxu0 %v6830_v50 }
 0x90b   :  { %6277 = vmatpush3.msra.mxu0 %v6966_v43 }
 0x90c   :  { %6278 = vmatprep.subr.mxu0 %v6830_v50 }
 0x90d   :  { %6279 = vmatpush3.msra.mxu0 %v6972_v45 }
 0x90e   :  { %6294 = vmatprep.subr.mxu0 %v6830_v50 }
 0x9aa   :  { %v2436_v32 = vpop.f32.mrf.mxu1 }
 0x9ac   :  { %v6227_v33 = vpop.f32.mrf.mxu1 }
 0x9b2   :  { %v2593_v34 = vpop.f32.mrf.mxu1 }
 0x9b3   :  { %v2345_v36 = vpop.f32.mrf.mxu0 }
 0x9b4   :  { %v6249_v39 = vpop.f32.mrf.mxu1  ;;  %v2437_v57 = vadd.f32 %v2436_v32, %v2345_v36 }
 0x9b5   :  { %v6216_v48 = vpop.f32.mrf.mxu0 }
 0x9bb   :  { %v2516_v51 = vpop.f32.mrf.mxu0 }
 0x9bc   :  { %v2751_v56 = vpop.f32.mrf.mxu1  ;;  %v2517_v63 = vadd.f32 %v2516_v51, %v2437_v57 }
 0x9bd   :  { %v6238_v61 = vpop.f32.mrf.mxu0 }
 0x9be   :  { %v6271_v62 = vpop.f32.mrf.mxu1  ;;  %v2594_v2 = vadd.f32 %v2593_v34, %v2517_v63 }
 0x9c4   :  { %v2676_v3 = vpop.f32.mrf.mxu0 }
 0x9c5   :  { %v2677_v4 = vadd.f32 %v2676_v3, %v2594_v2 }
 0x9c6   :  { %v6260_v5 = vpop.f32.mrf.mxu0 }
 0x9c7   :  { %v2752_v6 = vadd.f32 %v2751_v56, %v2677_v4 }
 0x9c9   :  { %v2756_v7 = vrot.slane %v2752_v6, 4 }
 0x9cb   :  { %v2758_v8 = vadd.f32 %v2756_v7, %v7103_v30 }
 0x9cd   :  { %6654 = vtanh.f32 %v2758_v8  ;;  %v5634_v10 = vmul.f32 -1.442695, %v2758_v8 }
 0x9cf   :  { %6656 = vpow2.f32 %v5634_v10 }
 0x9da   :  { %v6655_v9 = vpop.eup %6654 }
 0x9db   :  { %2771 = vrot.lane.b32.xlu0 %v6655_v9, %s6832_s2 }
 0x9dc   :  { %v6657_v11 = vpop.eup %6656 }
 0x9dd   :  { %v2762_v12 = vadd.f32 1.0, %v6657_v11 }
 0x9df   :  { %6658 = vrcp.f32 %v2762_v12 }
 0x9ec   :  { %v6659_v13 = vpop.eup %6658 }
 0x9ed   :  { %v2769_v60 = vmul.f32 %v6659_v13, %v2767_v19 }
 0xa4d   :  { %v2772_v16 = vpop.permute.xlu0 %2771 }
 0xa4e   :  { %v2774_v17 = vmul.f32 %v6659_v13, %v2772_v16 }
 0xa50   :  { %2776 = vrot.lane.b32.xlu1 %v2774_v17, %s6833_s15 }
 0xac2   :  { %v2777_v0 = vpop.permute.xlu1 %2776 }
 0xac3   :  { %v7333_v1 = vadd.f32 %v2777_v0, %v2769_v60 }
 0xac5   :  { %6660 = vtanh.f32 %v7333_v1  ;;  %v3286_v16 = vrot.slane %v7333_v1, 4 }
 0xad2   :  { %v6661_v30 = vpop.eup %6660 }
 0xad3   :  { %2782 = vrot.lane.b32.xlu0 %v6661_v30, %s6832_s2 }
 0xb45   :  { %v2783_v14 = vpop.permute.xlu0 %2782 }
 0xb46   :  { %v7337_v20 = vmul.f32 %v6659_v13, %v2783_v14 }
 0xb48   :  { %v2787_v21 = vrot.slane %v7337_v20, 4 }
 0xb4a   :  { %2788 = vrot.lane.b32.xlu1 %v2787_v21, %s6833_s15 }
 0xbbc   :  { %v2789_v23 = vpop.permute.xlu1 %2788 }
 0xbbd   :  { %v2790_v26 = vsel %vm711_vm2, %v2789_v23, 0 }
 0xbbe   :  { %v2861_v15 = vand.u32 4294901760, %v2790_v26 }
 0xbc0   :  { %v2862_v27 = vsub.f32 %v2790_v26, %v2861_v15  ;;  %6292 = vmatmul.mubr.f32.vlgmr.msra.gmra.mxu1 %v2861_v15 }
 0xbc1   :  { %6306 = vmatpush3.msra.mxu1 %v6946_v35  ;;  %6313 = vmatprep.mubr.msk.f32.mxu1 %vm6831_vm1, %v6830_v50 }
 0xbc2   :  { %v2863_v22 = vand.u32 4294901760, %v2862_v27  ;;  %6307 = vmatprep.subr.mxu1 %v6830_v50 }
 0xbc3   :  { %6308 = vmatpush3.msra.mxu1 %v6948_v37 }
 0xbc4   :  { %v2864_v29 = vsub.f32 %v2862_v27, %v2863_v22  ;;  %6309 = vmatprep.subr.mxu1 %v6830_v50 }
 0xbc5   :  { %6310 = vmatpush3.msra.mxu1 %v6966_v43 }
 0xbc6   :  { %v2865_v25 = vand.u32 4294901760, %v2864_v29  ;;  %6311 = vmatprep.subr.mxu1 %v6830_v50 }
 0xbc7   :  { %6312 = vmatpush3.msra.mxu1 %v6972_v45 }
 0xbc8   :  { %6314 = vmatmul.mubr.f32.vlgmr.msra.gmra.mxu1 %v2863_v22  ;;  %6327 = vmatprep.subr.mxu1 %v6830_v50 }
 0xbc9   :  { %6281 = vmatmul.mubr.f32.vlgmr.msra.gmra.mxu0 %v2865_v25  ;;  %6328 = vmatpush3.msra.mxu1 %v6946_v35 }
 0xbca   :  { %6295 = vmatpush3.msra.mxu0 %v6956_v40  ;;  %6329 = vmatprep.subr.mxu1 %v6830_v50 }
 0xbcb   :  { %6296 = vmatprep.subr.mxu0 %v6830_v50  ;;  %6330 = vmatpush3.msra.mxu1 %v6948_v37 }
 0xbcc   :  { %6297 = vmatpush3.msra.mxu0 %v6964_v42  ;;  %6331 = vmatprep.subr.mxu1 %v6830_v50 }
 0xbcd   :  { %6298 = vmatprep.subr.mxu0 %v6830_v50  ;;  %6332 = vmatpush3.msra.mxu1 %v6966_v43 }
 0xbce   :  { %6299 = vmatpush3.msra.mxu0 %v6979_v47  ;;  %6333 = vmatprep.subr.mxu1 %v6830_v50 }
 0xbcf   :  { %6300 = vmatprep.subr.mxu0 %v6830_v50  ;;  %6302 = vmatprep.mubr.msk.f32.mxu0 %vm6831_vm1, %v6830_v50 }
 0xbd0   :  { %6301 = vmatpush3.msra.mxu0 %v6985_v49  ;;  %6334 = vmatpush3.msra.mxu1 %v6972_v45 }
 0xbd1   :  { %6335 = vmatprep.mubr.msk.f32.mxu1 %vm6831_vm1, %v6830_v50  ;;  %6303 = vmatmul.mubr.f32.vlgmr.msra.gmra.mxu0 %v2862_v27 }
 0xbd2   :  { %6316 = vmatprep.subr.mxu0 %v6830_v50  ;;  %6336 = vmatmul.mubr.f32.vlgmr.msra.gmra.mxu1 %v2861_v15 }
 0xbd3   :  { %6317 = vmatpush3.msra.mxu0 %v6970_v44  ;;  %6324 = vmatprep.mubr.msk.f32.mxu0 %vm6831_vm1, %v6830_v50 }
 0xbd4   :  { %6318 = vmatprep.subr.mxu0 %v6830_v50  ;;  %6349 = vmatprep.subr.mxu1 %v6830_v50 }
 0xbd5   :  { %6319 = vmatpush3.msra.mxu0 %v6976_v46  ;;  %6350 = vmatpush3.msra.mxu1 %v6996_v53 }
 0xbd6   :  { %6320 = vmatprep.subr.mxu0 %v6830_v50  ;;  %6351 = vmatprep.subr.mxu1 %v6830_v50 }
 0xbd7   :  { %6321 = vmatpush3.msra.mxu0 %v6992_v52  ;;  %6352 = vmatpush3.msra.mxu1 %v7001_v55 }
 0xbd8   :  { %6322 = vmatprep.subr.mxu0 %v6830_v50  ;;  %6353 = vmatprep.subr.mxu1 %v6830_v50 }
 0xbd9   :  { %6323 = vmatpush3.msra.mxu0 %v6999_v54  ;;  %6354 = vmatpush3.msra.mxu1 %v7015_v58 }
 0xbda   :  { %6325 = vmatmul.mubr.f32.vlgmr.msra.gmra.mxu0 %v2861_v15  ;;  %6355 = vmatprep.subr.mxu1 %v6830_v50 }
 0xbdb   :  { %6356 = vmatpush3.msra.mxu1 %v7021_v59  ;;  %6338 = vmatprep.subr.mxu0 %v6830_v50 }
 0xbdc   :  { %6357 = vmatprep.mubr.msk.f32.mxu1 %vm6831_vm1, %v6830_v50  ;;  %6371 = vmatprep.subr.mxu1 %v6830_v50 }
 0xbdd   :  { %6339 = vmatpush3.msra.mxu0 %v6946_v35  ;;  %6346 = vmatprep.mubr.msk.f32.mxu0 %vm6831_vm1, %v6830_v50 }
 0xbde   :  { %6340 = vmatprep.subr.mxu0 %v6830_v50 }
 0xbdf   :  { %6341 = vmatpush3.msra.mxu0 %v6948_v37 }
 0xbe0   :  { %6342 = vmatprep.subr.mxu0 %v6830_v50 }
 0xbe1   :  { %6343 = vmatpush3.msra.mxu0 %v6966_v43 }
 0xbe2   :  { %6344 = vmatprep.subr.mxu0 %v6830_v50 }
 0xbe3   :  { %6345 = vmatpush3.msra.mxu0 %v6972_v45 }
 0xbe4   :  { %6360 = vmatprep.subr.mxu0 %v6830_v50 }
 0xc80   :  { %v2958_v31 = vpop.f32.mrf.mxu1 }
 0xc82   :  { %v6293_v32 = vpop.f32.mrf.mxu1 }
 0xc88   :  { %v3115_v33 = vpop.f32.mrf.mxu1 }
 0xc89   :  { %v2867_v34 = vpop.f32.mrf.mxu0 }
 0xc8a   :  { %v6315_v36 = vpop.f32.mrf.mxu1  ;;  %v2959_v56 = vadd.f32 %v2958_v31, %v2867_v34 }
 0xc8b   :  { %v6282_v39 = vpop.f32.mrf.mxu0 }
 0xc91   :  { %v3038_v48 = vpop.f32.mrf.mxu0 }
 0xc92   :  { %v3273_v51 = vpop.f32.mrf.mxu1  ;;  %v3039_v62 = vadd.f32 %v3038_v48, %v2959_v56 }
 0xc93   :  { %v6304_v57 = vpop.f32.mrf.mxu0 }
 0xc94   :  { %v6337_v61 = vpop.f32.mrf.mxu1  ;;  %v3116_v63 = vadd.f32 %v3115_v33, %v3039_v62 }
 0xc9a   :  { %v3198_v2 = vpop.f32.mrf.mxu0 }
 0xc9b   :  { %v3199_v3 = vadd.f32 %v3198_v2, %v3116_v63 }
 0xc9c   :  { %v6326_v4 = vpop.f32.mrf.mxu0 }
 0xc9d   :  { %v3274_v5 = vadd.f32 %v3273_v51, %v3199_v3 }
 0xc9f   :  { %v3277_v6 = vadd.f32 %v3274_v5, %v7107_v41 }
 0xca1   :  { %6662 = vtanh.f32 %v3277_v6  ;;  %v5635_v8 = vmul.f32 -1.442695, %v3277_v6 }
 0xca3   :  { %6664 = vpow2.f32 %v5635_v8 }
 0xcae   :  { %v6663_v7 = vpop.eup %6662 }
 0xcaf   :  { %3290 = vrot.lane.b32.xlu0 %v6663_v7, %s6832_s2 }
 0xcb0   :  { %v6665_v9 = vpop.eup %6664 }
 0xcb1   :  { %v3281_v10 = vadd.f32 1.0, %v6665_v9 }
 0xcb3   :  { %6666 = vrcp.f32 %v3281_v10 }
 0xcc0   :  { %v6667_v11 = vpop.eup %6666 }
 0xcc1   :  { %v3288_v17 = vmul.f32 %v6667_v11, %v3286_v16 }
 0xd21   :  { %v3291_v12 = vpop.permute.xlu0 %3290 }
 0xd22   :  { %v3293_v13 = vmul.f32 %v6667_v11, %v3291_v12 }
 0xd24   :  { %3295 = vrot.lane.b32.xlu1 %v3293_v13, %s6833_s15 }
 0xd96   :  { %v3296_v19 = vpop.permute.xlu1 %3295 }
 0xd97   :  { %v7406_v60 = vadd.f32 %v3296_v19, %v3288_v17 }
 0xd99   :  { %6668 = vtanh.f32 %v7406_v60  ;;  %v3807_v13 = vrot.slane %v7406_v60, 4 }
 0xda6   :  { %v6669_v0 = vpop.eup %6668 }
 0xda7   :  { %3301 = vrot.lane.b32.xlu0 %v6669_v0, %s6832_s2 }
 0xe19   :  { %v3302_v30 = vpop.permute.xlu0 %3301 }
 0xe1a   :  { %v7410_v14 = vmul.f32 %v6667_v11, %v3302_v30 }
 0xe1c   :  { %3306 = vrot.lane.b32.xlu1 %v7410_v14, %s6833_s15 }
 0xe8e   :  { %v3307_v21 = vpop.permute.xlu1 %3306 }
 0xe8f   :  { %v3308_v23 = vsel %vm711_vm2, %v3307_v21, 0 }
 0xe90   :  { %v3379_v26 = vand.u32 4294901760, %v3308_v23 }
 0xe92   :  { %v3380_v1 = vsub.f32 %v3308_v23, %v3379_v26  ;;  %6358 = vmatmul.mubr.f32.vlgmr.msra.gmra.mxu1 %v3379_v26 }
 0xe93   :  { %6372 = vmatpush3.msra.mxu1 %v6946_v35  ;;  %6379 = vmatprep.mubr.msk.f32.mxu1 %vm6831_vm1, %v6830_v50 }
 0xe94   :  { %v3381_v15 = vand.u32 4294901760, %v3380_v1  ;;  %6373 = vmatprep.subr.mxu1 %v6830_v50 }
 0xe95   :  { %6374 = vmatpush3.msra.mxu1 %v6948_v37 }
 0xe96   :  { %v3382_v27 = vsub.f32 %v3380_v1, %v3381_v15  ;;  %6375 = vmatprep.subr.mxu1 %v6830_v50 }
 0xe97   :  { %6376 = vmatpush3.msra.mxu1 %v6966_v43 }
 0xe98   :  { %v3383_v22 = vand.u32 4294901760, %v3382_v27  ;;  %6377 = vmatprep.subr.mxu1 %v6830_v50 }
 0xe99   :  { %6378 = vmatpush3.msra.mxu1 %v6972_v45 }
 0xe9a   :  { %6380 = vmatmul.mubr.f32.vlgmr.msra.gmra.mxu1 %v3381_v15  ;;  %6393 = vmatprep.subr.mxu1 %v6830_v50 }
 0xe9b   :  { %6347 = vmatmul.mubr.f32.vlgmr.msra.gmra.mxu0 %v3383_v22  ;;  %6394 = vmatpush3.msra.mxu1 %v6946_v35 }
 0xe9c   :  { %6361 = vmatpush3.msra.mxu0 %v6956_v40  ;;  %6395 = vmatprep.subr.mxu1 %v6830_v50 }
 0xe9d   :  { %6362 = vmatprep.subr.mxu0 %v6830_v50  ;;  %6396 = vmatpush3.msra.mxu1 %v6948_v37 }
 0xe9e   :  { %6363 = vmatpush3.msra.mxu0 %v6964_v42  ;;  %6397 = vmatprep.subr.mxu1 %v6830_v50 }
 0xe9f   :  { %6364 = vmatprep.subr.mxu0 %v6830_v50  ;;  %6398 = vmatpush3.msra.mxu1 %v6966_v43 }
 0xea0   :  { %6365 = vmatpush3.msra.mxu0 %v6979_v47  ;;  %6399 = vmatprep.subr.mxu1 %v6830_v50 }
 0xea1   :  { %6366 = vmatprep.subr.mxu0 %v6830_v50  ;;  %6368 = vmatprep.mubr.msk.f32.mxu0 %vm6831_vm1, %v6830_v50 }
 0xea2   :  { %6367 = vmatpush3.msra.mxu0 %v6985_v49  ;;  %6400 = vmatpush3.msra.mxu1 %v6972_v45 }
 0xea3   :  { %6401 = vmatprep.mubr.msk.f32.mxu1 %vm6831_vm1, %v6830_v50  ;;  %6369 = vmatmul.mubr.f32.vlgmr.msra.gmra.mxu0 %v3380_v1 }
 0xea4   :  { %6382 = vmatprep.subr.mxu0 %v6830_v50  ;;  %6402 = vmatmul.mubr.f32.vlgmr.msra.gmra.mxu1 %v3379_v26 }
 0xea5   :  { %6383 = vmatpush3.msra.mxu0 %v6970_v44  ;;  %6390 = vmatprep.mubr.msk.f32.mxu0 %vm6831_vm1, %v6830_v50 }
 0xea6   :  { %6384 = vmatprep.subr.mxu0 %v6830_v50  ;;  %6415 = vmatprep.subr.mxu1 %v6830_v50 }
 0xea7   :  { %6385 = vmatpush3.msra.mxu0 %v6976_v46  ;;  %6416 = vmatpush3.msra.mxu1 %v6996_v53 }
 0xea8   :  { %6386 = vmatprep.subr.mxu0 %v6830_v50  ;;  %6417 = vmatprep.subr.mxu1 %v6830_v50 }
 0xea9   :  { %6387 = vmatpush3.msra.mxu0 %v6992_v52  ;;  %6418 = vmatpush3.msra.mxu1 %v7001_v55 }
 0xeaa   :  { %6388 = vmatprep.subr.mxu0 %v6830_v50  ;;  %6419 = vmatprep.subr.mxu1 %v6830_v50 }
 0xeab   :  { %6389 = vmatpush3.msra.mxu0 %v6999_v54  ;;  %6420 = vmatpush3.msra.mxu1 %v7015_v58 }
 0xeac   :  { %6391 = vmatmul.mubr.f32.vlgmr.msra.gmra.mxu0 %v3379_v26  ;;  %6421 = vmatprep.subr.mxu1 %v6830_v50 }
 0xead   :  { %6422 = vmatpush3.msra.mxu1 %v7021_v59  ;;  %6404 = vmatprep.subr.mxu0 %v6830_v50 }
 0xeae   :  { %6423 = vmatprep.mubr.msk.f32.mxu1 %vm6831_vm1, %v6830_v50  ;;  %6437 = vmatprep.subr.mxu1 %v6830_v50 }
 0xeaf   :  { %6405 = vmatpush3.msra.mxu0 %v6946_v35  ;;  %6412 = vmatprep.mubr.msk.f32.mxu0 %vm6831_vm1, %v6830_v50 }
 0xeb0   :  { %6406 = vmatprep.subr.mxu0 %v6830_v50 }
 0xeb1   :  { %6407 = vmatpush3.msra.mxu0 %v6948_v37 }
 0xeb2   :  { %6408 = vmatprep.subr.mxu0 %v6830_v50 }
 0xeb3   :  { %6409 = vmatpush3.msra.mxu0 %v6966_v43 }
 0xeb4   :  { %6410 = vmatprep.subr.mxu0 %v6830_v50 }
 0xeb5   :  { %6411 = vmatpush3.msra.mxu0 %v6972_v45 }
 0xeb6   :  { %6426 = vmatprep.subr.mxu0 %v6830_v50 }
 0xf52   :  { %v3476_v29 = vpop.f32.mrf.mxu1 }
 0xf54   :  { %v6359_v25 = vpop.f32.mrf.mxu1 }
 0xf5a   :  { %v3633_v31 = vpop.f32.mrf.mxu1 }
 0xf5b   :  { %v3385_v32 = vpop.f32.mrf.mxu0 }
 0xf5c   :  { %v6381_v33 = vpop.f32.mrf.mxu1  ;;  %v3477_v48 = vadd.f32 %v3476_v29, %v3385_v32 }
 0xf5d   :  { %v6348_v34 = vpop.f32.mrf.mxu0 }
 0xf63   :  { %v3556_v36 = vpop.f32.mrf.mxu0 }
 0xf64   :  { %v3791_v39 = vpop.f32.mrf.mxu1  ;;  %v3557_v57 = vadd.f32 %v3556_v36, %v3477_v48 }
 0xf65   :  { %v6370_v51 = vpop.f32.mrf.mxu0 }
 0xf66   :  { %v6403_v56 = vpop.f32.mrf.mxu1  ;;  %v3634_v61 = vadd.f32 %v3633_v31, %v3557_v57 }
 0xf6c   :  { %v3716_v62 = vpop.f32.mrf.mxu0 }
 0xf6d   :  { %v3717_v63 = vadd.f32 %v3716_v62, %v3634_v61 }
 0xf6e   :  { %v6392_v2 = vpop.f32.mrf.mxu0 }
 0xf6f   :  { %v3792_v3 = vadd.f32 %v3791_v39, %v3717_v63 }
 0xf71   :  { %v3796_v4 = vrot.slane %v3792_v3, 4 }
 0xf73   :  { %v3798_v5 = vadd.f32 %v3796_v4, %v7107_v41 }
 0xf75   :  { %6670 = vtanh.f32 %v3798_v5  ;;  %v5636_v7 = vmul.f32 -1.442695, %v3798_v5 }
 0xf77   :  { %6672 = vpow2.f32 %v5636_v7 }
 0xf82   :  { %v6671_v6 = vpop.eup %6670 }
 0xf83   :  { %3811 = vrot.lane.b32.xlu0 %v6671_v6, %s6832_s2 }
 0xf84   :  { %v6673_v8 = vpop.eup %6672 }
 0xf85   :  { %v3802_v9 = vadd.f32 1.0, %v6673_v8 }
 0xf87   :  { %6674 = vrcp.f32 %v3802_v9 }
 0xf94   :  { %v6675_v10 = vpop.eup %6674 }
 0xf95   :  { %v3809_v16 = vmul.f32 %v6675_v10, %v3807_v13 }
 0xff5   :  { %v3812_v11 = vpop.permute.xlu0 %3811 }
 0xff6   :  { %v3814_v12 = vmul.f32 %v6675_v10, %v3812_v11 }
 0xff8   :  { %3816 = vrot.lane.b32.xlu1 %v3814_v12, %s6833_s15 }
0x106a   :  { %v3817_v17 = vpop.permute.xlu1 %3816 }
0x106b   :  { %v7479_v19 = vadd.f32 %v3817_v17, %v3809_v16 }
0x106d   :  { %6676 = vtanh.f32 %v7479_v19  ;;  %v4326_v8 = vrot.slane %v7479_v19, 4 }
0x107a   :  { %v6677_v41 = vpop.eup %6676 }
0x107b   :  { %3822 = vrot.lane.b32.xlu0 %v6677_v41, %s6832_s2 }
0x10ed   :  { %v3823_v0 = vpop.permute.xlu0 %3822 }
0x10ee   :  { %v7483_v30 = vmul.f32 %v6675_v10, %v3823_v0 }
0x10f0   :  { %v3827_v21 = vrot.slane %v7483_v30, 4 }
0x10f2   :  { %3828 = vrot.lane.b32.xlu1 %v3827_v21, %s6833_s15 }
0x1164   :  { %v3829_v23 = vpop.permute.xlu1 %3828 }
0x1165   :  { %v3830_v26 = vsel %vm711_vm2, %v3829_v23, 0 }
0x1166   :  { %v3901_v60 = vand.u32 4294901760, %v3830_v26 }
0x1168   :  { %v3902_v1 = vsub.f32 %v3830_v26, %v3901_v60  ;;  %6424 = vmatmul.mubr.f32.vlgmr.msra.gmra.mxu1 %v3901_v60 }
0x1169   :  { %6438 = vmatpush3.msra.mxu1 %v6946_v35  ;;  %6445 = vmatprep.mubr.msk.f32.mxu1 %vm6831_vm1, %v6830_v50 }
0x116a   :  { %v3903_v15 = vand.u32 4294901760, %v3902_v1  ;;  %6439 = vmatprep.subr.mxu1 %v6830_v50 }
0x116b   :  { %6440 = vmatpush3.msra.mxu1 %v6948_v37 }
0x116c   :  { %v3904_v27 = vsub.f32 %v3902_v1, %v3903_v15  ;;  %6441 = vmatprep.subr.mxu1 %v6830_v50 }
0x116d   :  { %6442 = vmatpush3.msra.mxu1 %v6966_v43 }
0x116e   :  { %v3905_v22 = vand.u32 4294901760, %v3904_v27  ;;  %6443 = vmatprep.subr.mxu1 %v6830_v50 }
0x116f   :  { %6444 = vmatpush3.msra.mxu1 %v6972_v45 }
0x1170   :  { %6446 = vmatmul.mubr.f32.vlgmr.msra.gmra.mxu1 %v3903_v15  ;;  %6459 = vmatprep.subr.mxu1 %v6830_v50 }
0x1171   :  { %6413 = vmatmul.mubr.f32.vlgmr.msra.gmra.mxu0 %v3905_v22  ;;  %6460 = vmatpush3.msra.mxu1 %v6946_v35 }
0x1172   :  { %6427 = vmatpush3.msra.mxu0 %v6956_v40  ;;  %6461 = vmatprep.subr.mxu1 %v6830_v50 }
0x1173   :  { %6428 = vmatprep.subr.mxu0 %v6830_v50  ;;  %6462 = vmatpush3.msra.mxu1 %v6948_v37 }
0x1174   :  { %6429 = vmatpush3.msra.mxu0 %v6964_v42  ;;  %6463 = vmatprep.subr.mxu1 %v6830_v50 }
0x1175   :  { %6430 = vmatprep.subr.mxu0 %v6830_v50  ;;  %6464 = vmatpush3.msra.mxu1 %v6966_v43 }
0x1176   :  { %6431 = vmatpush3.msra.mxu0 %v6979_v47  ;;  %6465 = vmatprep.subr.mxu1 %v6830_v50 }
0x1177   :  { %6432 = vmatprep.subr.mxu0 %v6830_v50  ;;  %6434 = vmatprep.mubr.msk.f32.mxu0 %vm6831_vm1, %v6830_v50 }
0x1178   :  { %6433 = vmatpush3.msra.mxu0 %v6985_v49  ;;  %6466 = vmatpush3.msra.mxu1 %v6972_v45 }
0x1179   :  { %6467 = vmatprep.mubr.msk.f32.mxu1 %vm6831_vm1, %v6830_v50  ;;  %6435 = vmatmul.mubr.f32.vlgmr.msra.gmra.mxu0 %v3902_v1 }
0x117a   :  { %6448 = vmatprep.subr.mxu0 %v6830_v50  ;;  %6468 = vmatmul.mubr.f32.vlgmr.msra.gmra.mxu1 %v3901_v60 }
0x117b   :  { %6449 = vmatpush3.msra.mxu0 %v6970_v44  ;;  %6456 = vmatprep.mubr.msk.f32.mxu0 %vm6831_vm1, %v6830_v50 }
0x117c   :  { %6450 = vmatprep.subr.mxu0 %v6830_v50  ;;  %6481 = vmatprep.subr.mxu1 %v6830_v50 }
0x117d   :  { %6451 = vmatpush3.msra.mxu0 %v6976_v46  ;;  %6482 = vmatpush3.msra.mxu1 %v6996_v53 }
0x117e   :  { %6452 = vmatprep.subr.mxu0 %v6830_v50  ;;  %6483 = vmatprep.subr.mxu1 %v6830_v50 }
0x117f   :  { %6453 = vmatpush3.msra.mxu0 %v6992_v52  ;;  %6484 = vmatpush3.msra.mxu1 %v7001_v55 }
0x1180   :  { %6454 = vmatprep.subr.mxu0 %v6830_v50  ;;  %6485 = vmatprep.subr.mxu1 %v6830_v50 }
0x1181   :  { %6455 = vmatpush3.msra.mxu0 %v6999_v54  ;;  %6486 = vmatpush3.msra.mxu1 %v7015_v58 }
0x1182   :  { %6457 = vmatmul.mubr.f32.vlgmr.msra.gmra.mxu0 %v3901_v60  ;;  %6487 = vmatprep.subr.mxu1 %v6830_v50 }
0x1183   :  { %6488 = vmatpush3.msra.mxu1 %v7021_v59  ;;  %6470 = vmatprep.subr.mxu0 %v6830_v50 }
0x1184   :  { %6489 = vmatprep.mubr.msk.f32.mxu1 %vm6831_vm1, %v6830_v50  ;;  %6503 = vmatprep.subr.mxu1 %v6830_v50 }
0x1185   :  { %6471 = vmatpush3.msra.mxu0 %v6946_v35  ;;  %6478 = vmatprep.mubr.msk.f32.mxu0 %vm6831_vm1, %v6830_v50 }
0x1186   :  { %6472 = vmatprep.subr.mxu0 %v6830_v50 }
0x1187   :  { %6473 = vmatpush3.msra.mxu0 %v6948_v37 }
0x1188   :  { %6474 = vmatprep.subr.mxu0 %v6830_v50 }
0x1189   :  { %6475 = vmatpush3.msra.mxu0 %v6966_v43 }
0x118a   :  { %6476 = vmatprep.subr.mxu0 %v6830_v50 }
0x118b   :  { %6477 = vmatpush3.msra.mxu0 %v6972_v45 }
0x118c   :  { %6492 = vmatprep.subr.mxu0 %v6830_v50 }
0x1228   :  { %v3998_v53 = vpop.f32.mrf.mxu1 }
0x122a   :  { %v6425_v55 = vpop.f32.mrf.mxu1 }
0x1230   :  { %v4155_v58 = vpop.f32.mrf.mxu1 }
0x1231   :  { %v3907_v59 = vpop.f32.mrf.mxu0 }
0x1232   :  { %v6447_v29 = vpop.f32.mrf.mxu1  ;;  %v3999_v33 = vadd.f32 %v3998_v53, %v3907_v59 }
0x1233   :  { %v6414_v25 = vpop.f32.mrf.mxu0 }
0x1239   :  { %v4078_v31 = vpop.f32.mrf.mxu0 }
0x123a   :  { %v4313_v32 = vpop.f32.mrf.mxu1  ;;  %v4079_v39 = vadd.f32 %v4078_v31, %v3999_v33  ;;  %v4869_v33 = vsel %vm4866_vm3, %v7410_v14, %v7483_v30  ;;  %v4873_v30 = vld [vmem:[%s7771_s4 + $0x10] sm:$0xff] }
0x123b   :  { %v6436_v34 = vpop.f32.mrf.mxu0 }
0x123c   :  { %v6469_v36 = vpop.f32.mrf.mxu1  ;;  %v4156_v48 = vadd.f32 %v4155_v58, %v4079_v39  ;;  %v4874_v34 = vld [vmem:[%s7771_s4 + $0x18] sm:$0xff] }
0x123d   :  { %v7616_v36 = vand.u32 4294901760, %v4874_v34 }
0x123f   :  { %v7619_v39 = vsub.f32 %v4874_v34, %v7616_v36 }
0x1242   :  { %v4238_v51 = vpop.f32.mrf.mxu0 }
0x1243   :  { %v4239_v56 = vadd.f32 %v4238_v51, %v4156_v48  ;;  %v7631_v48 = vand.u32 4294901760, %v4873_v30  ;;  %v4872_v51 = vld [vmem:[%s7771_s4 + $0x8] sm:$0xff] }
0x1244   :  { %v6458_v57 = vpop.f32.mrf.mxu0 }
0x1245   :  { %v4314_v61 = vadd.f32 %v4313_v32, %v4239_v56  ;;  %v7638_v57 = vsub.f32 %v4873_v30, %v7631_v48 }
0x1247   :  { %v4317_v62 = vadd.f32 %v4314_v61, %v7105_v38  ;;  %v7640_v61 = vand.u32 4294901760, %v4872_v51 }
0x1249   :  { %6678 = vtanh.f32 %v4317_v62  ;;  %v5637_v2 = vmul.f32 -1.442695, %v4317_v62  ;;  %v4871_v62 = vld [vmem:[%s7771_s4] sm:$0xff] }
0x124b   :  { %6680 = vpow2.f32 %v5637_v2  ;;  %v7649_v2 = vand.u32 4294901760, %v7638_v57 }
0x1256   :  { %v6679_v63 = vpop.eup %6678 }
0x1257   :  { %4330 = vrot.lane.b32.xlu0 %v6679_v63, %s6832_s2 }
0x1258   :  { %v6681_v3 = vpop.eup %6680 }
0x1259   :  { %v4321_v4 = vadd.f32 1.0, %v6681_v3  ;;  %v7652_v3 = vsub.f32 %v4872_v51, %v7640_v61 }
0x125b   :  { %6682 = vrcp.f32 %v4321_v4  ;;  %v7654_v4 = vand.u32 4294901760, %v4871_v62 }
0x1268   :  { %v6683_v5 = vpop.eup %6682 }
0x1269   :  { %v4328_v9 = vmul.f32 %v6683_v5, %v4326_v8  ;;  %v7661_v8 = vand.u32 4294901760, %v7652_v3 }
0x12c9   :  { %v4331_v6 = vpop.permute.xlu0 %4330 }
0x12ca   :  { %v4333_v7 = vmul.f32 %v6683_v5, %v4331_v6 }
0x12cc   :  { %4335 = vrot.lane.b32.xlu1 %v4333_v7, %s6833_s15  ;;  %v5046_v7 = vsub.f32 %v7638_v57, %v7649_v2 }
0x133e   :  { %v4336_v10 = vpop.permute.xlu1 %4335 }
0x133f   :  { %v7552_v11 = vadd.f32 %v4336_v10, %v4328_v9  ;;  %v7664_v9 = vsub.f32 %v4871_v62, %v7654_v4  ;;  %v5047_v10 = vand.u32 4294901760, %v5046_v7 }
0x1341   :  { %6684 = vtanh.f32 %v7552_v11  ;;  %v4847_v56 = vrot.slane %v7552_v11, 4  ;;  %v5053_v11 = vsub.f32 %v7652_v3, %v7661_v8 }
0x134e   :  { %v6685_v12 = vpop.eup %6684 }
0x134f   :  { %4341 = vrot.lane.b32.xlu0 %v6685_v12, %s6832_s2  ;;  %v7671_v12 = vand.u32 4294901760, %v7664_v9 }
0x13c1   :  { %v4342_v13 = vpop.permute.xlu0 %4341 }
0x13c2   :  { %v7556_v16 = vmul.f32 %v6683_v5, %v4342_v13 }
0x13c4   :  { %4346 = vrot.lane.b32.xlu1 %v7556_v16, %s6833_s15 }
0x1436   :  { %v4347_v17 = vpop.permute.xlu1 %4346 }
0x1437   :  { %v4348_v41 = vsel %vm711_vm2, %v4347_v17, 0 }
0x1438   :  { %v4419_v0 = vand.u32 4294901760, %v4348_v41 }
0x143a   :  { %v4420_v19 = vsub.f32 %v4348_v41, %v4419_v0  ;;  %6490 = vmatmul.mubr.f32.vlgmr.msra.gmra.mxu1 %v4419_v0  ;;  %v5054_v41 = vand.u32 4294901760, %v5053_v11 }
0x143b   :  { %6504 = vmatpush3.msra.mxu1 %v6946_v35  ;;  %6511 = vmatprep.mubr.msk.f32.mxu1 %vm6831_vm1, %v6830_v50 }
0x143c   :  { %v4421_v21 = vand.u32 4294901760, %v4420_v19  ;;  %6505 = vmatprep.subr.mxu1 %v6830_v50 }
0x143d   :  { %6506 = vmatpush3.msra.mxu1 %v6948_v37 }
0x143e   :  { %v4422_v23 = vsub.f32 %v4420_v19, %v4421_v21  ;;  %6507 = vmatprep.subr.mxu1 %v6830_v50 }
0x143f   :  { %6508 = vmatpush3.msra.mxu1 %v6966_v43 }
0x1440   :  { %v4423_v26 = vand.u32 4294901760, %v4422_v23  ;;  %6509 = vmatprep.subr.mxu1 %v6830_v50 }
0x1441   :  { %6510 = vmatpush3.msra.mxu1 %v6972_v45 }
0x1442   :  { %6512 = vmatmul.mubr.f32.vlgmr.msra.gmra.mxu1 %v4421_v21  ;;  %6525 = vmatprep.subr.mxu1 %v6830_v50 }
0x1443   :  { %6479 = vmatmul.mubr.f32.vlgmr.msra.gmra.mxu0 %v4423_v26  ;;  %6526 = vmatpush3.msra.mxu1 %v6946_v35 }
0x1444   :  { %6493 = vmatpush3.msra.mxu0 %v6956_v40  ;;  %6527 = vmatprep.subr.mxu1 %v6830_v50 }
0x1445   :  { %6494 = vmatprep.subr.mxu0 %v6830_v50  ;;  %6528 = vmatpush3.msra.mxu1 %v6948_v37 }
0x1446   :  { %6495 = vmatpush3.msra.mxu0 %v6964_v42  ;;  %6529 = vmatprep.subr.mxu1 %v6830_v50 }
0x1447   :  { %6496 = vmatprep.subr.mxu0 %v6830_v50  ;;  %6530 = vmatpush3.msra.mxu1 %v6966_v43 }
0x1448   :  { %6497 = vmatpush3.msra.mxu0 %v6979_v47  ;;  %6531 = vmatprep.subr.mxu1 %v6830_v50 }
0x1449   :  { %6498 = vmatprep.subr.mxu0 %v6830_v50  ;;  %6500 = vmatprep.mubr.msk.f32.mxu0 %vm6831_vm1, %v6830_v50 }
0x144a   :  { %6499 = vmatpush3.msra.mxu0 %v6985_v49  ;;  %6532 = vmatpush3.msra.mxu1 %v6972_v45 }
0x144b   :  { %6533 = vmatprep.mubr.msk.f32.mxu1 %vm6831_vm1, %v6830_v50  ;;  %6501 = vmatmul.mubr.f32.vlgmr.msra.gmra.mxu0 %v4420_v19 }
0x144c   :  { %6514 = vmatprep.subr.mxu0 %v6830_v50  ;;  %6534 = vmatmul.mubr.f32.vlgmr.msra.gmra.mxu1 %v4419_v0 }
0x144d   :  { %6515 = vmatpush3.msra.mxu0 %v6970_v44  ;;  %6522 = vmatprep.mubr.msk.f32.mxu0 %vm6831_vm1, %v6830_v50 }
0x144e   :  { %6516 = vmatprep.subr.mxu0 %v6830_v50 }
0x144f   :  { %6517 = vmatpush3.msra.mxu0 %v6976_v46 }
0x1450   :  { %6518 = vmatprep.subr.mxu0 %v6830_v50 }
0x1451   :  { %6519 = vmatpush3.msra.mxu0 %v6992_v52 }
0x1452   :  { %6520 = vmatprep.subr.mxu0 %v6830_v50 }
0x1453   :  { %6521 = vmatpush3.msra.mxu0 %v6999_v54 }
0x1454   :  { %6523 = vmatmul.mubr.f32.vlgmr.msra.gmra.mxu0 %v4419_v0  ;;  %6536 = vmatprep.subr.mxu0 %v7616_v36  ;;  %v5060_v0 = vsub.f32 %v7664_v9, %v7671_v12 }
0x1455   :  { %6537 = vmatpush3.msra.mxu0 %v7616_v36 }
0x1456   :  { %6538 = vmatprep.subr.mxu0 %v7631_v48  ;;  %v5061_v21 = vand.u32 4294901760, %v5060_v0 }
0x1457   :  { %6539 = vmatpush3.msra.mxu0 %v7631_v48 }
0x1458   :  { %6540 = vmatprep.subr.mxu0 %v7640_v61 }
0x1459   :  { %6541 = vmatpush3.msra.mxu0 %v7640_v61 }
0x145a   :  { %6542 = vmatprep.subr.mxu0 %v7654_v4 }
0x145b   :  { %6543 = vmatpush3.msra.mxu0 %v7654_v4 }
0x145c   :  { %6564 = vmatprep.subr.mxu0 %v7619_v39 }
0x14fa   :  { %v4516_v35 = vpop.f32.mrf.mxu1 }
0x14fc   :  { %v6491_v37 = vpop.f32.mrf.mxu1 }
0x1502   :  { %v4673_v40 = vpop.f32.mrf.mxu1 }
0x1503   :  { %v4425_v42 = vpop.f32.mrf.mxu0 }
0x1504   :  { %v6513_v43 = vpop.f32.mrf.mxu1  ;;  %v4517_v49 = vadd.f32 %v4516_v35, %v4425_v42  ;;  %v4868_v42 = vsel %vm4866_vm3, %v7264_v18, %v7337_v20 }
0x1505   :  { %v6480_v44 = vpop.f32.mrf.mxu0 }
0x150b   :  { %v4596_v45 = vpop.f32.mrf.mxu0 }
0x150c   :  { %v4831_v47 = vpop.f32.mrf.mxu1  ;;  %v4597_v1 = vadd.f32 %v4596_v45, %v4517_v49 }
0x150d   :  { %v6502_v60 = vpop.f32.mrf.mxu0 }
0x150e   :  { %v6535_v46 = vpop.f32.mrf.mxu1  ;;  %v4674_v15 = vadd.f32 %v4673_v40, %v4597_v1 }
0x1514   :  { %v4756_v27 = vpop.f32.mrf.mxu0 }
0x1515   :  { %v4757_v52 = vadd.f32 %v4756_v27, %v4674_v15 }
0x1516   :  { %v6524_v22 = vpop.f32.mrf.mxu0 }
0x1517   :  { %v4832_v50 = vadd.f32 %v4831_v47, %v4757_v52 }
0x1519   :  { %v4836_v53 = vrot.slane %v4832_v50, 4 }
0x151b   :  { %v4838_v54 = vadd.f32 %v4836_v53, %v7105_v38  ;;  %v4867_v38 = vsel %vm4866_vm3, %v7118_v28, %v7191_v24  ;;  %v7624_v28 = vand.u32 4294901760, %v7619_v39 }
0x151d   :  { %6686 = vtanh.f32 %v4838_v54  ;;  %v5638_v58 = vmul.f32 -1.442695, %v4838_v54  ;;  %v5039_v24 = vsub.f32 %v7619_v39, %v7624_v28 }
0x151f   :  { %6688 = vpow2.f32 %v5638_v58  ;;  %v5040_v14 = vand.u32 4294901760, %v5039_v24 }
0x1521   :  { %6550 = vmatprep.subr.mxu1 %v5040_v14 }
0x1522   :  { %6551 = vmatpush3.msra.mxu1 %v5040_v14 }
0x1523   :  { %6552 = vmatprep.subr.mxu1 %v5047_v10 }
0x1524   :  { %6553 = vmatpush3.msra.mxu1 %v5047_v10 }
0x1525   :  { %6554 = vmatprep.subr.mxu1 %v5054_v41 }
0x1526   :  { %6555 = vmatpush3.msra.mxu1 %v5054_v41 }
0x1527   :  { %6556 = vmatprep.subr.mxu1 %v5061_v21 }
0x1528   :  { %6557 = vmatpush3.msra.mxu1 %v5061_v21 }
0x1529   :  { %6578 = vmatprep.subr.mxu1 %v7616_v36 }
0x152a   :  { %v6687_v55 = vpop.eup %6686 }
0x152b   :  { %4851 = vrot.lane.b32.xlu0 %v6687_v55, %s6832_s2 }
0x152c   :  { %v6689_v59 = vpop.eup %6688 }
0x152d   :  { %v4842_v29 = vadd.f32 1.0, %v6689_v59 }
0x152f   :  { %6690 = vrcp.f32 %v4842_v29 }
0x153c   :  { %v7601_v25 = vpop.eup %6690 }
0x153d   :  { %v4849_v63 = vmul.f32 %v7601_v25, %v4847_v56 }
0x159d   :  { %v4852_v31 = vpop.permute.xlu0 %4851 }
0x159e   :  { %v4854_v32 = vmul.f32 %v7601_v25, %v4852_v31 }
0x15a0   :  { %4856 = vrot.lane.b32.xlu1 %v4854_v32, %s6833_s15 }
0x15a4   :  { %4886 = vrot.lane.b32.xlu1 %v4867_v38, %s6833_s15 }
0x15a8   :  { %4890 = vrot.lane.b32.xlu1 %v4869_v33, %s6833_s15 }
0x1612   :  { %v4857_v5 = vpop.permute.xlu1 %4856 }
0x1613   :  { %v4859_v6 = vadd.f32 %v4857_v5, %v4849_v63 }
0x1615   :  { %6692 = vtanh.f32 %v4859_v6 }
0x1616   :  { %v4887_v13 = vpop.permute.xlu1 %4886 }
0x1617   :  { %v4894_v17 = vsel %vm711_vm2, %v4887_v13, 0 }
0x1618   :  { %v7677_v19 = vand.u32 4294901760, %v4894_v17 }
0x161a   :  { %v7680_v23 = vsub.f32 %v4894_v17, %v7677_v19  ;;  %6558 = vmatprep.mubr.f32.mxu1 %v7677_v19  ;;  %v4891_v43 = vpop.permute.xlu1 %4890 }
0x161b   :  { %v4898_v44 = vsel %vm711_vm2, %v4891_v43, 0 }
0x161c   :  { %v4973_v26 = vand.u32 4294901760, %v7680_v23  ;;  %v7692_v45 = vand.u32 4294901760, %v4898_v44 }
0x161e   :  { %v4974_v35 = vsub.f32 %v7680_v23, %v4973_v26  ;;  %v4992_v60 = vsub.f32 %v4898_v44, %v7692_v45 }
0x1620   :  { %v4975_v37 = vand.u32 4294901760, %v4974_v35  ;;  %v4993_v15 = vand.u32 4294901760, %v4992_v60 }
0x1622   :  { %v6693_v40 = vpop.eup %6692  ;;  %6544 = vmatprep.mubr.f32.mxu0 %v4975_v37 }
0x1623   :  { %4862 = vrot.lane.b32.xlu0 %v6693_v40, %s6832_s2 }
0x1627   :  { %4888 = vrot.lane.b32.xlu0 %v4868_v42, %s6833_s15 }
0x1695   :  { %v4863_v47 = vpop.permute.xlu0 %4862 }
0x1696   :  { %v4865_v49 = vmul.f32 %v7601_v25, %v4863_v47 }
0x1698   :  { %v4870_v46 = vsel %vm4866_vm3, %v7556_v16, %v4865_v49  ;;  %v4994_v16 = vsub.f32 %v4992_v60, %v4993_v15 }
0x1699   :  { %4892 = vrot.lane.b32.xlu0 %v4870_v46, %s6833_s15  ;;  %v4889_v1 = vpop.permute.xlu0 %4888 }
0x169a   :  { %v4896_v18 = vsel %vm711_vm2, %v4889_v1, 0  ;;  %v4995_v53 = vand.u32 4294901760, %v4994_v16 }
0x169b   :  { %v7700_v20 = vand.u32 4294901760, %v4896_v18 }
0x169d   :  { %v4982_v27 = vsub.f32 %v4896_v18, %v7700_v20  ;;  %6559 = vmatmul.mubr.f32.vlgmr.msra.gmra.mxu1 %v7700_v20 }
0x169e   :  { %6561 = vmatprep.mubr.f32.mxu1 %v7692_v45  ;;  %6579 = vmatpush3.msra.mxu1 %v7616_v36 }
0x169f   :  { %v4983_v52 = vand.u32 4294901760, %v4982_v27  ;;  %6580 = vmatprep.subr.mxu1 %v7631_v48 }
0x16a0   :  { %6581 = vmatpush3.msra.mxu1 %v7631_v48 }
0x16a1   :  { %v4984_v22 = vsub.f32 %v4982_v27, %v4983_v52  ;;  %6582 = vmatprep.subr.mxu1 %v7640_v61 }
0x16a2   :  { %6583 = vmatpush3.msra.mxu1 %v7640_v61 }
0x16a3   :  { %v4985_v50 = vand.u32 4294901760, %v4984_v22  ;;  %6584 = vmatprep.subr.mxu1 %v7654_v4 }
0x16a4   :  { %6585 = vmatpush3.msra.mxu1 %v7654_v4 }
0x16a5   :  { %6545 = vmatmul.mubr.f32.vlgmr.msra.gmra.mxu0 %v4985_v50  ;;  %6606 = vmatprep.subr.mxu1 %v7616_v36 }
0x16a6   :  { %6547 = vmatprep.mubr.f32.mxu0 %v4995_v53  ;;  %6565 = vmatpush3.msra.mxu0 %v7619_v39 }
0x16a7   :  { %6566 = vmatprep.subr.mxu0 %v7638_v57 }
0x16a8   :  { %6567 = vmatpush3.msra.mxu0 %v7638_v57 }
0x16a9   :  { %6568 = vmatprep.subr.mxu0 %v7652_v3 }
0x16aa   :  { %6569 = vmatpush3.msra.mxu0 %v7652_v3 }
0x16ab   :  { %6570 = vmatprep.subr.mxu0 %v7664_v9 }
0x16ac   :  { %6571 = vmatpush3.msra.mxu0 %v7664_v9 }
0x16ad   :  { %6592 = vmatprep.subr.mxu0 %v7624_v28 }
0x170b   :  { %v4893_v54 = vpop.permute.xlu0 %4892 }
0x170c   :  { %v4900_v55 = vsel %vm711_vm2, %v4893_v54, 0 }
0x170d   :  { %v5001_v58 = vand.u32 4294901760, %v4900_v55 }
0x170f   :  { %v5002_v59 = vsub.f32 %v4900_v55, %v5001_v58  ;;  %6562 = vmatmul.mubr.f32.gmra.mxu1 %v5001_v58 }
0x1710   :  { %6586 = vmatprep.mubr.f32.mxu1 %v4973_v26 }
0x1711   :  { %v5003_v29 = vand.u32 4294901760, %v5002_v59 }
0x1713   :  { %6587 = vmatmul.mubr.f32.vlgmr.msra.gmra.mxu1 %v4983_v52  ;;  %v5004_v25 = vsub.f32 %v5002_v59, %v5003_v29 }
0x1714   :  { %6589 = vmatprep.mubr.f32.mxu1 %v4993_v15  ;;  %6607 = vmatpush3.msra.mxu1 %v7616_v36 }
0x1715   :  { %6608 = vmatprep.subr.mxu1 %v7631_v48  ;;  %v5005_v31 = vand.u32 4294901760, %v5004_v25 }
0x1716   :  { %6609 = vmatpush3.msra.mxu1 %v7631_v48 }
0x1717   :  { %6548 = vmatmul.mubr.f32.gmra.mxu0 %v5005_v31  ;;  %6590 = vmatmul.mubr.f32.gmra.mxu1 %v5003_v29 }
0x1718   :  { %6610 = vmatprep.subr.mxu1 %v7640_v61  ;;  %6572 = vmatprep.mubr.f32.mxu0 %v7680_v23 }
0x1719   :  { %6611 = vmatpush3.msra.mxu1 %v7640_v61  ;;  %6614 = vmatprep.mubr.f32.mxu1 %v7677_v19 }
0x171a   :  { %6612 = vmatprep.subr.mxu1 %v7654_v4 }
0x171b   :  { %6613 = vmatpush3.msra.mxu1 %v7654_v4  ;;  %6573 = vmatmul.mubr.f32.vlgmr.msra.gmra.mxu0 %v4982_v27 }
0x171c   :  { %6593 = vmatpush3.msra.mxu0 %v7624_v28  ;;  %6615 = vmatmul.mubr.f32.vlgmr.msra.gmra.mxu1 %v7700_v20  ;;  %v5639_v28 = vld [vmem:[#allocation7] ss:$0 sm:$0xff] }
0x171d   :  { %6575 = vmatprep.mubr.f32.mxu0 %v4992_v60  ;;  %6594 = vmatprep.subr.mxu0 %v7649_v2 }
0x171e   :  { %6617 = vmatprep.mubr.f32.mxu1 %v7692_v45  ;;  %6595 = vmatpush3.msra.mxu0 %v7649_v2 }
0x171f   :  { %6596 = vmatprep.subr.mxu0 %v7661_v8  ;;  %6576 = vmatmul.mubr.f32.gmra.mxu0 %v5002_v59 }
0x1720   :  { %6597 = vmatpush3.msra.mxu0 %v7661_v8  ;;  %6618 = vmatmul.mubr.f32.gmra.mxu1 %v5001_v58 }
0x1721   :  { %6598 = vmatprep.subr.mxu0 %v7671_v12  ;;  %6600 = vmatprep.mubr.f32.mxu0 %v7677_v19 }
0x1722   :  { %6599 = vmatpush3.msra.mxu0 %v7671_v12 }
0x1723   :  { %6601 = vmatmul.mubr.f32.vlgmr.msra.gmra.mxu0 %v7700_v20 }
0x1724   :  { %6603 = vmatprep.mubr.f32.mxu0 %v7692_v45 }
0x1727   :  { %6604 = vmatmul.mubr.f32.gmra.mxu0 %v5001_v58 }
0x175d   :  { %v6560_v32 = vpop.f32.mrf.mxu1 }
0x175f   :  { %v5098_v38 = vpop.f32.mrf.mxu1 }
0x1765   :  { %v6546_v34 = vpop.f32.mrf.mxu0 }
0x1766   :  { %v4988_v48 = vadd.f32 %v6546_v34, %v5639_v28 }
0x1767   :  { %v4977_v24 = vpop.f32.mrf.mxu0 }
0x1768   :  { %v4978_v57 = vadd.f32 %v5639_v28, %v4977_v24  ;;  %v5105_v2 = vadd.f32 %v6560_v32, %v4988_v48 }
0x176a   :  { %v5099_v5 = vadd.f32 %v5098_v38, %v4978_v57 }
0x17cf   :  { %v6563_v33 = vpop.f32.mrf.mxu1 }
0x17d1   :  { %v5110_v36 = vpop.f32.mrf.mxu1 }
0x17d3   :  { %v6588_v39 = vpop.f32.mrf.mxu1 }
0x17d5   :  { %v5294_v14 = vpop.f32.mrf.mxu1 }
0x17d7   :  { %v6549_v30 = vpop.f32.mrf.mxu0  ;;  %v6591_v51 = vpop.f32.mrf.mxu1 }
0x17d8   :  { %v5008_v62 = vadd.f32 %v6549_v30, %v5639_v28 }
0x17d9   :  { %v4997_v56 = vpop.f32.mrf.mxu0  ;;  %v5310_v63 = vpop.f32.mrf.mxu1 }
0x17da   :  { %v4998_v6 = vadd.f32 %v5639_v28, %v4997_v56  ;;  %v5117_v10 = vadd.f32 %v6563_v33, %v5008_v62 }
0x17db   :  { %v6574_v61 = vpop.f32.mrf.mxu0 }
0x17dc   :  { %v5204_v4 = vadd.f32 %v6574_v61, %v5105_v2  ;;  %v6616_v8 = vpop.f32.mrf.mxu1  ;;  %v5111_v17 = vadd.f32 %v5110_v36, %v4998_v6 }
0x17dd   :  { %v5196_v3 = vpop.f32.mrf.mxu0 }
0x17de   :  { %v5197_v9 = vadd.f32 %v5196_v3, %v5099_v5  ;;  %v5303_v13 = vadd.f32 %v6588_v39, %v5204_v4  ;;  %v5494_v0 = vpop.f32.mrf.mxu1  ;;  %v5560_v5 = vlaneseq }
0x17df   :  { %v6577_v7 = vpop.f32.mrf.mxu0 }
0x17e0   :  { %v5218_v12 = vadd.f32 %v6577_v7, %v5117_v10  ;;  %v5295_v21 = vadd.f32 %v5294_v14, %v5197_v9  ;;  %v6619_v43 = vpop.f32.mrf.mxu1  ;;  %v5561_v6 = vshrl.u32 %v5560_v5, 7  ;;  %v5552_v7 = vld [vmem:[#allocation8] sm:$0x1] }
0x17e1   :  { %v5210_v11 = vpop.f32.mrf.mxu0 }
0x17e2   :  { %v5211_v23 = vadd.f32 %v5210_v11, %v5111_v17  ;;  %v5319_v37 = vadd.f32 %v6591_v51, %v5218_v12  ;;  %v5506_v15 = vpop.f32.mrf.mxu1  ;;  %v5556_v11 = vld [vmem:[#allocation10] sm:$0x1] }
0x17e3   :  { %v6602_v41 = vpop.f32.mrf.mxu0 }
0x17e4   :  { %v5408_v19 = vadd.f32 %v6602_v41, %v5303_v13  ;;  %v5311_v47 = vadd.f32 %v5310_v63, %v5211_v23 }
0x17e5   :  { %v5401_v26 = vpop.f32.mrf.mxu0 }
0x17e6   :  { %v5402_v35 = vadd.f32 %v5401_v26, %v5295_v21  ;;  %v5501_v40 = vadd.f32 %v6616_v8, %v5408_v19  ;;  %v5562_v8 = vsub.s32 0, %v5561_v6 }
0x17e7   :  { %v6605_v42 = vpop.f32.mrf.mxu0 }
0x17e8   :  { %v5495_v44 = vadd.f32 %v5494_v0, %v5402_v35  ;;  %v5420_v45 = vadd.f32 %v6605_v42, %v5319_v37  ;;  %v5533_v46 = vmul.f32 %v5501_v40, %v5501_v40  ;;  %v5518_v27 = vsel %vm5516_vm4, %v5501_v40, 0.0 }
0x17e9   :  { %v5413_v49 = vpop.f32.mrf.mxu0 }
0x17ea   :  { %v5532_v60 = vmul.f32 %v5495_v44, %v5495_v44  ;;  %v5517_v1 = vsel %vm5516_vm4, %v5495_v44, 0.0  ;;  %v5513_v18 = vadd.f32 %v6619_v43, %v5420_v45  ;;  %v5414_v20 = vadd.f32 %v5413_v49, %v5311_v47  ;;  %v5640_v43 = vld [vmem:[#allocation11] ss:$0 sm:$0xff] }
0x17eb   :  { %v5519_v22 = vadd.f32 %v5518_v27, %v5517_v1  ;;  %v5537_v50 = vsel %vm5516_vm4, %v5533_v46, 0.0 }
0x17ec   :  { %v5536_v52 = vsel %vm5516_vm4, %v5532_v60, 0.0  ;;  %v5507_v16 = vadd.f32 %v5506_v15, %v5414_v20  ;;  %v5535_v53 = vmul.f32 %v5513_v18, %v5513_v18  ;;  %v5522_v29 = vsel %vm5516_vm4, %v5513_v18, 0.0 }
0x17ed   :  { %v5538_v58 = vadd.f32 %v5537_v50, %v5536_v52  ;;  %v5641_v52 = vld [vmem:[#allocation2] ss:$0 sm:$0xff] }
0x17ee   :  { %v5520_v54 = vsel %vm5516_vm4, %v5507_v16, 0.0  ;;  %v5534_v55 = vmul.f32 %v5507_v16, %v5507_v16  ;;  %v5541_v38 = vsel %vm5516_vm4, %v5535_v53, 0.0 }
0x17ef   :  { %v5521_v59 = vadd.f32 %v5520_v54, %v5519_v22 }
0x17f0   :  { %v5539_v25 = vsel %vm5516_vm4, %v5534_v55, 0.0 }
0x17f1   :  { %v5523_v31 = vadd.f32 %v5522_v29, %v5521_v59  ;;  %v5540_v32 = vadd.f32 %v5539_v25, %v5538_v58 }
0x17f3   :  { %v5524_v33 = vrot.slane %v5523_v31, 4  ;;  %v5542_v34 = vadd.f32 %v5541_v38, %v5540_v32 }
0x17f5   :  { %v5525_v36 = vadd.f32 %v5524_v33, %v5523_v31  ;;  %v5543_v39 = vrot.slane %v5542_v34, 4 }
0x17f7   :  { %v5526_v28 = vrot.slane %v5525_v36, 2  ;;  %v5544_v24 = vadd.f32 %v5543_v39, %v5542_v34 }
0x17f9   :  { %v5527_v14 = vadd.f32 %v5526_v28, %v5525_v36  ;;  %v5545_v30 = vrot.slane %v5544_v24, 2 }
0x17fb   :  { %v5528_v48 = vrot.slane %v5527_v14, 1  ;;  %v5546_v51 = vadd.f32 %v5545_v30, %v5544_v24 }
0x17fd   :  { %v5529_v56 = vadd.f32 %v5528_v48, %v5527_v14  ;;  %v5547_v57 = vrot.slane %v5546_v51, 1 }
0x17ff   :  { %v5531_v61 = vmul.f32 0.03125, %v5529_v56  ;;  %v5548_v62 = vadd.f32 %v5547_v57, %v5546_v51 }
0x1801   :  { %v5549_v63 = vmul.f32 0.03125, %v5548_v62  ;;  %v5550_v2 = vmul.f32 %v5531_v61, %v5531_v61 }
0x1803   :  { %v5551_v3 = vsub.f32 %v5549_v63, %v5550_v2 }
0x1805   :  { %v5553_v4 = vadd.f32 1e-05, %v5551_v3 }
0x1807   :  { %6694 = vrsqrt.f32 %v5553_v4 }
0x1814   :  { %v6695_v9 = vpop.eup %6694 }
0x1815   :  { %v5555_v10 = vmul.f32 %v6695_v9, %v5552_v7 }
0x1817   :  { %v5557_v12 = vmul.f32 %v5555_v10, %v5531_v61  ;;  %v5563_v13 = vrot.slane %v5555_v10, %v5562_v8 }
0x1819   :  { %v5558_v17 = vsub.f32 %v5556_v11, %v5557_v12  ;;  %v5566_v41 = vmul.f32 %v5563_v13, %v5501_v40  ;;  %v5565_v19 = vmul.f32 %v5563_v13, %v5495_v44  ;;  %v5567_v21 = vmul.f32 %v5563_v13, %v5507_v16 }
0x181a   :  { %v5568_v23 = vmul.f32 %v5563_v13, %v5513_v18 }
0x181b   :  { %v5573_v0 = vrot.slane %v5558_v17, %v5562_v8 }
0x181d   :  { %v5576_v26 = vadd.f32 %v5573_v0, %v5566_v41  ;;  %v5575_v35 = vadd.f32 %v5573_v0, %v5565_v19  ;;  %v5577_v37 = vadd.f32 %v5573_v0, %v5567_v21  ;;  %v5578_v42 = vadd.f32 %v5573_v0, %v5568_v23 }
0x181f   :  { %v5580_v45 = vmax.f32 %v5576_v26, 0.0  ;;  %v5579_v47 = vmax.f32 %v5575_v35, 0.0  ;;  %v5581_v49 = vmax.f32 %v5577_v37, 0.0  ;;  %v5582_v60 = vmax.f32 %v5578_v42, 0.0 }
0x1821   :  { %v5591_v46 = vmul.f32 %v5640_v43, %v5580_v45  ;;  %v5590_v1 = vmul.f32 %v5640_v43, %v5579_v47  ;;  %v5592_v40 = vmul.f32 %v5640_v43, %v5581_v49  ;;  %v5593_v27 = vmul.f32 %v5640_v43, %v5582_v60 }
0x1823   :  { %v5597_v20 = vsel %vm5516_vm4, %v5591_v46, 0.0  ;;  %v5594_v15 = vsel %vm5516_vm4, %v5590_v1, 0.0  ;;  %v5600_v44 = vsel %vm5516_vm4, %v5592_v40, 0.0  ;;  %v5603_v18 = vsel %vm5516_vm4, %v5593_v27, 0.0 }
0x1824   :  { %5598 = vadd.xlane.f32.xlu0 %v5597_v20  ;;  %5595 = vadd.xlane.f32.xlu1 %v5594_v15 }
0x1828   :  { %5601 = vadd.xlane.f32.xlu0 %v5600_v44  ;;  %5604 = vadd.xlane.f32.xlu1 %v5603_v18 }
0x18ad   :  { %v5599_v16 = vpop.xlane.xlu0 %5598  ;;  %v5596_v22 = vpop.xlane.xlu1 %5595 }
0x18ae   :  { %v5614_v50 = vadd.f32 %v5641_v52, %v5599_v16  ;;  %v5613_v53 = vadd.f32 %v5641_v52, %v5596_v22 }
0x18b0   :  { %5619 = vst.msk [vmem:[%s7777_s10 + $0x8] sm:$0xff] %vm5617_vm5, %v5614_v50  ;;  %5618 = vst.msk [vmem:[%s7777_s10] sm:$0xff] %vm5617_vm5, %v5613_v53 }
0x18b1   :  { %v5602_v54 = vpop.xlane.xlu0 %5601  ;;  %v5605_v55 = vpop.xlane.xlu1 %5604 }
0x18b2   :  { %v5615_v58 = vadd.f32 %v5641_v52, %v5602_v54  ;;  %v5616_v59 = vadd.f32 %v5641_v52, %v5605_v55 }
0x18b4   :  { %5620 = vst.msk [vmem:[%s7777_s10 + $0x10] sm:$0xff] %vm5617_vm5, %v5615_v58  ;;  %5621 = vst.msk [vmem:[%s7777_s10 + $0x18] sm:$0xff] %vm5617_vm5, %v5616_v59 }
0x18b5   :  { %5626 = vsyncpa [#allocation4], 1 }
0x18b6   :  { %5627 = vsyncpa [#allocation6], 1 }
0x18b7   :  { %5628 = vsyncpa [#allocation9], 1 }
0x18b8   :  { %5629 = vsyncpa [#allocation12], 1 }

</bundles_post_ra>
